<compile_context>
chip_gen: v7x
topology: tpu7x:2x2x1
jax: 0.10.0
libtpu: 0.0.40
codegen_flags: <defaults>
</compile_context>

<pallas_src>
import math

import jax
import jax.numpy as jnp
from jax import lax
from jax.experimental import pallas as pl
from jax.experimental.pallas import tpu as pltpu


# contract the last dim of both operands: a @ b.T (MXU-native trans_b matmul)
_TRANS_B = (((1,), (1,)), ((), ()))


def _ffn_kernel(x_ref, wgu_ref, wd_ref, o_ref, acc_ref):
    # x_ref  : (TM, H)      rows of the flattened activation (constant over h, i)
    # wgu_ref: (2, TI, H)   [0] = gate rows, [1] = up rows of gate_up_proj.weight
    # wd_ref : (TH, TI)     output-rows x reduction-cols tile of down_proj.weight
    # o_ref  : (TM, TH)     output rows (resident across the i reduction axis)
    # acc_ref: (TM, TH) f32 accumulator scratch
    i = pl.program_id(2)

    x = x_ref[...]
    gate = lax.dot_general(x, wgu_ref[0], _TRANS_B, preferred_element_type=jnp.float32)
    up = lax.dot_general(x, wgu_ref[1], _TRANS_B, preferred_element_type=jnp.float32)
    # up * silu(gate) in f32, cast back to the input dtype for the MXU
    inter = (up * (gate * jax.nn.sigmoid(gate))).astype(x.dtype)
    partial = lax.dot_general(inter, wd_ref[...], _TRANS_B,
                              preferred_element_type=jnp.float32)

    @pl.when(i == 0)
    def _():
        acc_ref[...] = partial

    @pl.when(i > 0)
    def _():
        acc_ref[...] = acc_ref[...] + partial

    @pl.when(i == pl.num_programs(2) - 1)
    def _():
        o_ref[...] = acc_ref[...].astype(o_ref.dtype)


def _round_up(x, m):
    return ((x + m - 1) // m) * m


def omnigen_feed_forward(hidden_states, gate_up_weight, down_weight, *,
                         tm=None, ti=None, th=None, interpret=False):
    """Matches OmniGenFeedForward.forward.

    hidden_states : (..., H)
    gate_up_weight: (2*I, H)  torch nn.Linear layout (gate rows first, then up rows)
    down_weight   : (H, I)    torch nn.Linear layout
    th            : optional output-H tile; pass H//2 on v7x decode so both
                    TensorCores get work when there is only one row tile.
    """
    orig_shape = hidden_states.shape
    H = orig_shape[-1]
    two_i, h_w = gate_up_weight.shape
    assert two_i % 2 == 0, "gate_up weight must have an even number of rows"
    I = two_i // 2
    assert h_w == H and down_weight.shape == (H, I)

    x2d = hidden_states.reshape(-1, H)
    M = x2d.shape[0]

    # Torch-layout weights used directly: (2I, H) -> (2, I, H) is a free reshape.
    w_gu = gate_up_weight.reshape(2, I, H)

    # ---- per-generation tile targets & VMEM budgets -------------------------
    kind = ""
    try:
        kind = jax.devices()[0].device_kind.lower()
    except Exception:
        pass
    if "v7" in kind:
        tm_t, ti_t = 512, 256
        fit_budget, vmem_cap = 44 << 20, 56 << 20      # 64 MiB physical VMEM
    elif "v6" in kind:
        tm_t, ti_t = 512, 512
        fit_budget, vmem_cap = 88 << 20, 110 << 20     # 128 MiB physical VMEM
    elif "v5" in kind:
        tm_t, ti_t = 256, 512
        fit_budget, vmem_cap = 88 << 20, 110 << 20     # 128 MiB physical VMEM
    else:
        tm_t, ti_t = 256, 256
        fit_budget, vmem_cap = 40 << 20, 56 << 20      # conservative default

    if tm is None:
        tm = min(tm_t, _round_up(M, 8))                # decode / short seqs unchanged
    assert tm % 8 == 0, "row tile must be a multiple of 8"
    if ti is None:
        # reduction tile must divide I exactly (partial reduction tiles are unsafe)
        ti = next((c for c in (ti_t, 512, 256, 128) if c <= I and I % c == 0), I)
    assert I % ti == 0, "intermediate tile must divide intermediate_size"
    if th is None:
        th = H
    th = min(th, H)
    assert H % th == 0 and (th == H or th % 128 == 0)

    in_b = jnp.dtype(hidden_states.dtype).itemsize
    w_b = jnp.dtype(gate_up_weight.dtype).itemsize

    def _footprint(tm_, ti_, th_):
        return (2 * tm_ * H * in_b          # x tile, double buffered
                + 2 * 2 * ti_ * H * w_b     # fused gate+up tile, double buffered
                + 2 * th_ * ti_ * w_b       # down-proj tile, double buffered
                + 2 * tm_ * th_ * in_b      # output tile, double buffered
                + tm_ * th_ * 4)            # f32 accumulator scratch

    # shrink tiles (reduction tile first, never the lane-dense output width)
    while _footprint(tm, ti, th) > fit_budget:
        if ti > 128 and I % (ti // 2) == 0:
            ti //= 2
        elif tm > 128:
            tm = max(128, tm // 2)
        else:
            break

    vmem_limit = int(min(vmem_cap,
                         max(32 << 20, _footprint(tm, ti, th) + (16 << 20))))

    num_m = pl.cdiv(M, tm)      # ragged final block handled by Pallas masking
    num_h = H // th
    num_i = I // ti

    out = pl.pallas_call(
        _ffn_kernel,
        out_shape=jax.ShapeDtypeStruct((M, H), hidden_states.dtype),
        grid_spec=pltpu.PrefetchScalarGridSpec(
            num_scalar_prefetch=0,
            grid=(num_m, num_h, num_i),
            in_specs=[
                pl.BlockSpec((tm, H), lambda m, h, i: (m, 0)),         # activation rows
                pl.BlockSpec((2, ti, H), lambda m, h, i: (0, i, 0)),   # gate+up rows (one DMA)
                pl.BlockSpec((th, ti), lambda m, h, i: (h, i)),        # down-proj tile
            ],
            out_specs=pl.BlockSpec((tm, th), lambda m, h, i: (m, h)),
            scratch_shapes=[pltpu.VMEM((tm, th), jnp.float32)],
        ),
        compiler_params=pltpu.CompilerParams(
            dimension_semantics=("parallel", "parallel", "arbitrary"),
            vmem_limit_bytes=vmem_limit,
        ),
        interpret=interpret,
    )(x2d, w_gu, down_weight)

    return out.reshape(orig_shape)


def _reference(hidden_states, gate_up_weight, down_weight):
    # pure-JAX f32 reference mirroring the PyTorch forward
    x = hidden_states.astype(jnp.float32)
    w_gu = gate_up_weight.astype(jnp.float32)
    w_d = down_weight.astype(jnp.float32)
    up_states = x @ w_gu.T
    gate, up = jnp.split(up_states, 2, axis=-1)
    inter = up * jax.nn.silu(gate)
    return inter @ w_d.T


if __name__ == "__main__":
    B, S = 2, 64
    HIDDEN, INTER = 256, 512
    dtype = jnp.bfloat16

    key = jax.random.PRNGKey(0)
    kx, kg, kd = jax.random.split(key, 3)
    x = jax.random.normal(kx, (B, S, HIDDEN), jnp.float32).astype(dtype)
    gate_up_w = (jax.random.normal(kg, (2 * INTER, HIDDEN), jnp.float32)
                 * (1.0 / math.sqrt(HIDDEN))).astype(dtype)   # torch nn.Linear layout
    down_w = (jax.random.normal(kd, (HIDDEN, INTER), jnp.float32)
              * (1.0 / math.sqrt(INTER))).astype(dtype)       # torch nn.Linear layout

    out = omnigen_feed_forward(x, gate_up_w, down_w)
    jax.block_until_ready(out)
    assert out.shape == (B, S, HIDDEN)
    assert out.dtype == dtype

    ref = _reference(x, gate_up_w, down_w)
    rel = jnp.max(jnp.abs(out.astype(jnp.float32) - ref)) / (jnp.max(jnp.abs(ref)) + 1e-6)
    assert rel < 3e-2, f"max relative error too large: {rel}"

    # ragged row count (exercises the masked final row block, no wrapper padding)
    x2 = jax.random.normal(kd, (1, 77, HIDDEN), jnp.float32).astype(dtype)
    out2 = omnigen_feed_forward(x2, gate_up_w, down_w)
    jax.block_until_ready(out2)
    ref2 = _reference(x2, gate_up_w, down_w)
    rel2 = (jnp.max(jnp.abs(out2.astype(jnp.float32) - ref2))
            / (jnp.max(jnp.abs(ref2)) + 1e-6))
    assert rel2 < 3e-2, f"ragged-M max relative error too large: {rel2}"

    print("KERNEL_OK")
</pallas_src>

<mosaic_0001>
module attributes {stable_mosaic.version = 11 : i64} {
  func.func @_ffn_kernel(%arg0: i32, %arg1: i32, %arg2: i32, %arg3: memref<128x256xbf16, #tpu.memory_space<vmem>>, %arg4: memref<2x256x256xbf16, #tpu.memory_space<vmem>>, %arg5: memref<256x256xbf16, #tpu.memory_space<vmem>>, %arg6: memref<128x256xbf16, #tpu.memory_space<vmem>>, %arg7: memref<128x256xf32, #tpu.memory_space<vmem>>) attributes {dimension_semantics = [#tpu.dimension_semantics<parallel>, #tpu.dimension_semantics<parallel>, #tpu.dimension_semantics<arbitrary>], iteration_bounds = array<i64: 1, 1, 2>, scalar_prefetch = 0 : i64, scratch_operands = 1 : i64, tpu.core_type = #tpu.core_type<tc>, window_params = [{transform_indices = @transform_0, window_bounds = array<i64: 128, 256>}, {transform_indices = @transform_1, window_bounds = array<i64: 2, 256, 256>}, {transform_indices = @transform_2, window_bounds = array<i64: 256, 256>}, {transform_indices = @transform_3, window_bounds = array<i64: 128, 256>}]} {
    %c0 = arith.constant 0 : index
    %c0_0 = arith.constant 0 : index
    %0 = vector.load %arg3[%c0, %c0_0] : memref<128x256xbf16, #tpu.memory_space<vmem>>, vector<128x256xbf16>
    %c0_1 = arith.constant 0 : index
    %c0_2 = arith.constant 0 : index
    %c0_3 = arith.constant 0 : index
    %1 = vector.load %arg4[%c0_1, %c0_2, %c0_3] : memref<2x256x256xbf16, #tpu.memory_space<vmem>>, vector<1x256x256xbf16>
    %2 = vector.shape_cast %1 : vector<1x256x256xbf16> to vector<256x256xbf16>
    %cst = arith.constant dense<0.000000e+00> : vector<128x256xf32>
    %3 = tpu.matmul %0, %2, %cst {dimension_numbers = #tpu.dot_dimension_numbers<[1], [1], [0], [0], [0, 0, 1, 0], [], []>} : vector<128x256xbf16>, vector<256x256xbf16>, vector<128x256xf32> -> vector<128x256xf32>
    %c1 = arith.constant 1 : index
    %c0_4 = arith.constant 0 : index
    %c0_5 = arith.constant 0 : index
    %4 = vector.load %arg4[%c1, %c0_4, %c0_5] : memref<2x256x256xbf16, #tpu.memory_space<vmem>>, vector<1x256x256xbf16>
    %5 = vector.shape_cast %4 : vector<1x256x256xbf16> to vector<256x256xbf16>
    %cst_6 = arith.constant dense<0.000000e+00> : vector<128x256xf32>
    %6 = tpu.matmul %0, %5, %cst_6 {dimension_numbers = #tpu.dot_dimension_numbers<[1], [1], [0], [0], [0, 0, 1, 0], [], []>} : vector<128x256xbf16>, vector<256x256xbf16>, vector<128x256xf32> -> vector<128x256xf32>
    %7 = arith.negf %3 : vector<128x256xf32>
    %8 = math.exp %7 : vector<128x256xf32>
    %cst_7 = arith.constant 1.000000e+00 : f32
    %9 = vector.broadcast %cst_7 : f32 to vector<128x256xf32>
    %10 = arith.addf %9, %8 : vector<128x256xf32>
    %11 = arith.divf %9, %10 : vector<128x256xf32>
    %12 = arith.mulf %3, %11 : vector<128x256xf32>
    %13 = arith.mulf %6, %12 : vector<128x256xf32>
    %14 = arith.truncf %13 : vector<128x256xf32> to vector<128x256xbf16>
    %c0_8 = arith.constant 0 : index
    %c0_9 = arith.constant 0 : index
    %15 = vector.load %arg5[%c0_8, %c0_9] : memref<256x256xbf16, #tpu.memory_space<vmem>>, vector<256x256xbf16>
    %cst_10 = arith.constant dense<0.000000e+00> : vector<128x256xf32>
    %16 = tpu.matmul %14, %15, %cst_10 {dimension_numbers = #tpu.dot_dimension_numbers<[1], [1], [0], [0], [0, 0, 1, 0], [], []>} : vector<128x256xbf16>, vector<256x256xbf16>, vector<128x256xf32> -> vector<128x256xf32>
    %c0_i32 = arith.constant 0 : i32
    %17 = arith.cmpi eq, %arg2, %c0_i32 : i32
    %18 = arith.extui %17 : i1 to i32
    %c0_i32_11 = arith.constant 0 : i32
    %19 = arith.cmpi ne, %18, %c0_i32_11 : i32
    scf.if %19 {
      %c0_15 = arith.constant 0 : index
      %c0_16 = arith.constant 0 : index
      %26 = vector.load %arg7[%c0_15, %c0_16] : memref<128x256xf32, #tpu.memory_space<vmem>>, vector<128x256xf32>
      tpu.vector_store %arg7[%c0_15, %c0_16], %16 {strides = array<i32>} : memref<128x256xf32, #tpu.memory_space<vmem>>, vector<128x256xf32>,
    } else {
    }
    %c0_i32_12 = arith.constant 0 : i32
    %20 = arith.cmpi sgt, %arg2, %c0_i32_12 : i32
    %21 = arith.extui %20 : i1 to i32
    %c0_i32_13 = arith.constant 0 : i32
    %22 = arith.cmpi ne, %21, %c0_i32_13 : i32
    scf.if %22 {
      %c0_15 = arith.constant 0 : index
      %c0_16 = arith.constant 0 : index
      %26 = vector.load %arg7[%c0_15, %c0_16] : memref<128x256xf32, #tpu.memory_space<vmem>>, vector<128x256xf32>
      %27 = arith.addf %26, %16 : vector<128x256xf32>
      %c0_17 = arith.constant 0 : index
      %c0_18 = arith.constant 0 : index
      %28 = vector.load %arg7[%c0_17, %c0_18] : memref<128x256xf32, #tpu.memory_space<vmem>>, vector<128x256xf32>
      tpu.vector_store %arg7[%c0_17, %c0_18], %27 {strides = array<i32>} : memref<128x256xf32, #tpu.memory_space<vmem>>, vector<128x256xf32>,
    } else {
    }
    %c1_i32 = arith.constant 1 : i32
    %23 = arith.cmpi eq, %arg2, %c1_i32 : i32
    %24 = arith.extui %23 : i1 to i32
    %c0_i32_14 = arith.constant 0 : i32
    %25 = arith.cmpi ne, %24, %c0_i32_14 : i32
    scf.if %25 {
      %c0_15 = arith.constant 0 : index
      %c0_16 = arith.constant 0 : index
      %26 = vector.load %arg7[%c0_15, %c0_16] : memref<128x256xf32, #tpu.memory_space<vmem>>, vector<128x256xf32>
      %27 = arith.truncf %26 : vector<128x256xf32> to vector<128x256xbf16>
      %c0_17 = arith.constant 0 : index
      %c0_18 = arith.constant 0 : index
      %28 = vector.load %arg6[%c0_17, %c0_18] : memref<128x256xbf16, #tpu.memory_space<vmem>>, vector<128x256xbf16>
      tpu.vector_store %arg6[%c0_17, %c0_18], %27 {strides = array<i32>} : memref<128x256xbf16, #tpu.memory_space<vmem>>, vector<128x256xbf16>,
    } else {
    }
    return
  }
  func.func @transform_0(%arg0: i32, %arg1: i32, %arg2: i32) -> (i32, i32) {
    %c0_i32 = arith.constant 0 : i32
    %c0_i32_0 = arith.constant 0 : i32
    return %arg0, %c0_i32 : i32, i32
  }
  func.func @transform_1(%arg0: i32, %arg1: i32, %arg2: i32) -> (i32, i32, i32) {
    %c0_i32 = arith.constant 0 : i32
    %c0_i32_0 = arith.constant 0 : i32
    %c0_i32_1 = arith.constant 0 : i32
    return %c0_i32, %arg2, %c0_i32_0 : i32, i32, i32
  }
  func.func @transform_2(%arg0: i32, %arg1: i32, %arg2: i32) -> (i32, i32) {
    %c0_i32 = arith.constant 0 : i32
    return %arg1, %arg2 : i32, i32
  }
  func.func @transform_3(%arg0: i32, %arg1: i32, %arg2: i32) -> (i32, i32) {
    %c0_i32 = arith.constant 0 : i32
    return %arg0, %arg1 : i32, i32
  }
}

</mosaic_0001>

<bundles_post_ra>
// kernel: tpu_custom_call.1
= control target key start
LH: loop header
LB: loop body
LE: loop exit
PB: predicated region body
PF: predicated region fallthrough
CT: control target
= control target key end

     0   :  { %8 = vsyncpa [#allocation4], 0  ;;  %s3472_s0 = inlined_call_operand.hbm [shape: bf16[128,256], index: 0, kind: input, shape index: {}]   ;;  %s3473_s1 = inlined_call_operand.hbm [shape: bf16[2,512,256], index: 1, kind: input, shape index: {}]   ;;  %s3474_s2 = inlined_call_operand.hbm [shape: bf16[256,512], index: 2, kind: input, shape index: {}]   ;;  %s3475_s3 = inlined_call_operand.hbm [shape: bf16[128,256], index: 3, kind: output, shape index: {}]  }
   0x1   :  { %9 = vsyncpa [#allocation7], 0 }
   0x2   :  { %11 = vsyncpa [#allocation7 + $0x1], 0 }
   0x3   :  { %12 = vsyncpa [#allocation5], 0  ;;  %s2819_s12 = smov 0   ;;  %s2821_s13 = smov 0  }
   0x4   :  { %s2823_s14 = smov 0   ;;  %s2825_s15 = smov 0  }
   0x5   :  { %s2827_s16 = smov 0   ;;  %s2829_s17 = smov 0  }
   0x6 LB: > { %s2848_s18 = sadd.s32 4294967295, %s2781_s17   ;;  %s30_s19 = sadd.s32 1, %s2777_s16  ;;  %s2781_s17 = sphi %s2829_s17, %s18_s17   ;;  %s2777_s16 = sphi %s2827_s16, %s3493_s16   ;;  %s2773_s15 = sphi %s2825_s15, %s3492_s15   ;;  %s2769_s14 = sphi %s2823_s14, %s3491_s14   ;;  %s2765_s13 = sphi %s2821_s13, %s3490_s13   ;;  %s2761_s12 = sphi %s2819_s12, %s3489_s12  }
   0x7   : > { %p31_p0 = scmp.ge.s32.totalorder %s30_s19, 2  ;;  %s70_s20 = sadd.s32 1, %s2769_s14 }
   0x8   : > { %p77_p1 = scmp.ne.s32.totalorder %s2769_s14, %s2765_s13  ;;  %p78_p2 = scmp.eq.s32.totalorder %s2781_s17, 0 }
   0x9   : > { %s3495_s19 = smov (%p31_p0, %s30_s19), 0  ;;  %p83_p4 = scmp.ne.s32.totalorder %s2765_s13, %s2761_s12 }
   0xa   : > { %p2857_p3 = por %p78_p2, %p77_p1  ;;  %s67_s22 = ssub.s32 %s2777_s16, %s3495_s19 }
   0xb   : > { %p3476_p5 = scmp.eq.s32.totalorder %s2848_s18, 0  ;;  %p68_p6 = scmp.eq.s32.totalorder %s67_s22, 0 }
   0xc   : > { %s3480_s21 = scalar_select %p2857_p3, 1, 0 }
   0xd   : > { %p1989_p7 = scmp.ge.s32.totalorder %s2781_s17, 1  ;;  %p2868_p8 = por %p3476_p5, %p83_p4 }
   0xe   : > { %p150_p9 = scmp.lt.s32.totalorder %s2781_s17, 3  ;;  %s2783_s26 = smov [#allocation3]  }
   0xf   : > { %s3481_s23 = scalar_select %p2868_p8, 1, 0 }
  0x10   : > { %s2874_s24 = scalar_select %p68_p6, %s2769_s14, %s70_s20  }
  0x11   : > { %p2876_p10 = pnand %p1989_p7, %p150_p9  ;;  %s166_s27 = sshll.u32 %s2783_s26, 4  ;;  %s167_s27 = int_to_ptr.vmem [resolvable:$true] %s166_s27 }
  0x12   : > { %s2641_s4 = scalar_lea.hbm %s3472_s0, 2048 }
  0x13   : > { %s3482_s25 = scalar_select %p2876_p10, 1, 0 }
  0x14   : > { %p2274_p11 = pneg %p2876_p10  ;;  %p2642_p13 = scmp.ne.s32.totalorder %s3472_s0, %s2641_s4 }
  0x15   : > { %p2648_p4 = scmp.lt.u32.totalorder %s2641_s4, %s3472_s0 }
  0x16   : > { %p2884_p12 = pnand %p2274_p11, %p3476_p5 }
  0x18   : > { %p2643_p0 = pneg %p2884_p12 }
  0x1a   : > { %p2644_p1 = pnand %p2643_p0, %p2642_p13 }
  0x1c   : > { %p2645_p2 = pneg %p2644_p1 }
  0x1e   : > { %p2650_p6 = pnand %p2648_p4, %p2645_p2 }
  0x20   : > { %2653 = shalt.err (!%p2650_p6)
}
  0x21   : > { %s2654_s9 = scalar_lea.vmem %s167_s27, 2048  ;;  %p2662_p5 = scmp.lt.s32.totalorder %s167_s27, %s167_s27 }
  0x22   : > { %p2655_p7 = scmp.ne.s32.totalorder %s167_s27, %s2654_s9  ;;  %p2663_p8 = scmp.lt.s32.totalorder %s2654_s9, %s2654_s9 }
  0x24   : > { %p2657_p9 = pnand %p2655_p7, %p2643_p0  ;;  %p2664_p10 = por %p2663_p8, %p2662_p5 }
  0x26   : > { %p2658_p11 = pneg %p2657_p9 }
  0x28   : > { %p2665_p3 = pnand %p2664_p10, %p2658_p11 }
  0x2a   : > { %2668 = shalt.err (!%p2665_p3)
}
  0x2b   : > { %s2784_s10 = smov 128   ;;  %s2785_s11 = smov 8  }
  0x2c   : > { %2277 = dma.hbm_to_vmem [thread:$0]  (!%p2884_p12), %s3472_s0, 2048, %s167_s27, [#allocation4], %s2784_s10, %s2784_s10, %s2785_s11  }
  0x2d   : > { %p1991_p13 = scmp.ge.s32.totalorder %s2781_s17, 2 }
  0x2f   : > { %176 = sbr.rel (%p1991_p13) target bundleno = 94 (0x5e), region = 20 }
  0x36   : > { %s180_s22 = sand.u32 1, %s2781_s17   ;;  %s182_s26 = sand.u32 1, %s2769_s14  }
  0x37   : > { %s1992_s29 = sshll.u32 %s182_s26, 9  ;;  %s2205_s28 = sshll.u32 %s2777_s16, 12 }
  0x38   : > { %s191_s27 = scalar_lea.hbm %s3473_s1, %s2205_s28  ;;  %p3484_p3 = scmp.ne.s32.totalorder %s3480_s21, 0 }
  0x39   : > { %s184_s6 = scalar_lea.vmem [#allocation6], %s1992_s29  ;;  %s2786_s9 = smov 8192  }
  0x3a   : > { %s2257_s5 = scalar_select %p3484_p3, [#allocation0], [#allocation12] }
  0x3b   : > { %s204_s7 = sshll.u32 %s184_s6, 4  ;;  %2258 = sst [smem:[#allocation11]] (%p3484_p3), %s2786_s9  ;;  %s205_s7 = int_to_ptr.vmem [resolvable:$true] %s204_s7 }
  0x3c   : > { %s196_s8 = sld [smem:[%s2257_s5]]   ;;  %s2787_s10 = smov 4096  }
  0x3d   : > { %2259 = sst [smem:[#allocation11 + $0x1]] (%p3484_p3), %s2787_s10  ;;  %s2788_s11 = smov 32  }
  0x3e   : > { %2260 = sst [smem:[#allocation11 + $0x2]] (%p3484_p3), %s2788_s11  ;;  %s2789_s12 = smov 128  }
  0x3f   : > { %2261 = sst [smem:[#allocation11 + $0x3]] (%p3484_p3), %s2789_s12  ;;  %s2790_s29 = smov 8  }
  0x40   : > { %2262 = sst [smem:[#allocation11 + $0x4]] (%p3484_p3), %s2789_s12  ;;  %s2925_s30 = scalar_lea.sflag [#allocation7], %s180_s22 }
  0x41   : > { %2263 = sst [smem:[#allocation11 + $0x5]] (%p3484_p3), %s2790_s29  ;;  %s2791_s4 = smov [#allocation10]  }
  0x42   : > { %s1996_s20 = sshll.u32 %s196_s8, 26  ;;  %s1998_s5 = sshll.u32 %s182_s26, 8 }
  0x43   : > { %s1997_s28 = sadd.s32 134217728, %s1996_s20  ;;  %s2206_s6 = sshll.u32 %s2777_s16, 7 }
  0x44   : > { %2264 = dma.general (%p3484_p3), %s191_s27, 8192, %s205_s7, %s2925_s30, %s2791_s4, [#allocation11], %s1997_s28, 0  }
  0x45   : > { %s2934_s11 = scalar_lea.hbm %s3474_s2, %s2206_s6  ;;  %s231_s8 = scalar_lea.vmem [#allocation8], %s1998_s5 }
  0x46   : > { %s241_s22 = sshll.u32 %s231_s8, 4  ;;  %s2669_s12 = scalar_lea.hbm %s2934_s11, 4096  ;;  %s2936_s22 = int_to_ptr.vmem [resolvable:$true] %s241_s22 }
  0x47   : > { %p2670_p5 = scmp.ne.s32.totalorder %s2934_s11, %s2669_s12  ;;  %s2673_s7 = scalar_lea.hbm %s3474_s2, 8192 }
  0x48   : > { %p2674_p12 = scmp.lt.u32.totalorder %s2934_s11, %s3474_s2  ;;  %p2675_p0 = scmp.lt.u32.totalorder %s2673_s7, %s2669_s12 }
  0x49   : > { %p2671_p8 = pnand %p2670_p5, %p3484_p3  ;;  %p2677_p2 = scmp.lt.u32.totalorder %s2669_s12, %s2934_s11 }
  0x4a   : > { %p2676_p1 = por %p2675_p0, %p2674_p12 }
  0x4b   : > { %p2672_p10 = pneg %p2671_p8 }
  0x4c   : > { %p2678_p4 = por %p2677_p2, %p2676_p1 }
  0x4e   : > { %p2679_p6 = pnand %p2678_p4, %p2672_p10 }
  0x50   : > { %2682 = shalt.err (!%p2679_p6)
}
  0x51   : > { %s2683_s28 = scalar_lea.vmem %s2936_s22, 4096  ;;  %s2792_s4 = smov [#allocation8]  }
  0x52   : > { %p2684_p7 = scmp.ne.s32.totalorder %s2936_s22, %s2683_s28  ;;  %s2687_s5 = sshll.u32 %s2792_s4, 4  ;;  %s2688_s5 = int_to_ptr.vmem [resolvable:$false] %s2687_s5 }
  0x53   : > { %s2689_s6 = scalar_lea.vmem %s2688_s5, 8192  ;;  %p2690_p13 = scmp.lt.s32.totalorder %s2936_s22, %s2688_s5 }
  0x54   : > { %p2685_p9 = pnand %p2684_p7, %p3484_p3  ;;  %p2691_p5 = scmp.lt.s32.totalorder %s2689_s6, %s2683_s28 }
  0x56   : > { %p2686_p11 = pneg %p2685_p9  ;;  %p2692_p8 = por %p2691_p5, %p2690_p13 }
  0x58   : > { %p2693_p12 = pnand %p2692_p8, %p2686_p11 }
  0x5a   : > { %2696 = shalt.err (!%p2693_p12)
}
  0x5b   : > { %s2793_s9 = smov 256   ;;  %s2794_s10 = smov 128  }
  0x5c   : > { %s2795_s8 = smov 8  }
  0x5d   : > { %2265 = dma.hbm_to_vmem [thread:$0]  (%p3484_p3), %s2934_s11, 4096, %s2936_s22, %s2925_s30, %s2793_s9, %s2794_s10, %s2795_s8  }
  0x5e PF: > { %p3485_p10 = scmp.ne.s32.totalorder %s3482_s25, 0 }
  0x5f   : > { %p3486_p0 = scmp.eq.s32.totalorder (!%p3485_p10), %s2848_s18, 0 }
  0x60   : > { %253 = sbr.rel (%p3485_p10) target bundleno = 823 (0x337), region = 32 }
  0x67   : > { %2748 = dma.done.wait (%p3486_p0), [#allocation4], 2048   ;;  %p3487_p1 = pmov %p3486_p0 }
  0x68   : > { %s259_s12 = sand.u32 1, %s2848_s18   ;;  %s261_s26 = sand.u32 1, %s2765_s13  }
  0x69   : > { %2750 = vsyncadd (%p3487_p1), [#allocation4], 4294965248  ;;  %s2003_s27 = sshll.u32 %s261_s26, 9  ;;  %s260_s21 = scalar_lea.sflag [#allocation7], %s259_s12 }
  0x6a   : > { %s2970_s30 = scalar_lea.vmem [#allocation6], %s2003_s27  ;;  %p3488_p3 = scmp.ne.s32.totalorder %s3481_s23, 0 }
  0x6c   : > { %2752 = dma.done.wait (%p3488_p3), %s260_s21, 12288  }
  0x6d   : > { %2754 = vsyncadd (%p3488_p3), %s260_s21, 4294955008  ;;  %v2345_v0 = vld [vmem:[%s2970_s30 + $0x4] ss:$8 sps:$4 sm:$0xff]   ;;  %v2347_v1 = vld [vmem:[%s2970_s30] ss:$8 sps:$4 sm:$0xff]   ;;  %s2004_s23 = sshll.u32 %s261_s26, 8 }
  0x6e   : > { %589 = vmatprep.subr.bf16.mxu0 %v2345_v0  ;;  %v2348_v2 = vld [vmem:[%s2970_s30 + $0x14] ss:$8 sps:$4 sm:$0xff]   ;;  %v2357_v3 = vld [vmem:[%s2970_s30 + $0x104] ss:$8 sps:$4 sm:$0xff]   ;;  %v2359_v4 = vld [vmem:[%s2970_s30 + $0x100] ss:$8 sps:$4 sm:$0xff]  }
  0x6f   : > { %590 = vmatpush1.bf16.xpose.msra.mxu0 %v2347_v1  ;;  %v2350_v5 = vld [vmem:[%s2970_s30 + $0x10] ss:$8 sps:$4 sm:$0xff]   ;;  %v2351_v6 = vld [vmem:[%s2970_s30 + $0x24] ss:$8 sps:$4 sm:$0xff]   ;;  %895 = vmatprep.subr.bf16.mxu1 %v2357_v3  ;;  %v2363_v7 = vld [vmem:[%s2970_s30 + $0x114] ss:$8 sps:$4 sm:$0xff]  }
  0x70   : > { %591 = vmatprep.subr.bf16.mxu0 %v2348_v2  ;;  %896 = vmatpush1.bf16.xpose.msra.mxu1 %v2359_v4  ;;  %v2365_v8 = vld [vmem:[%s2970_s30 + $0x110] ss:$8 sps:$4 sm:$0xff]   ;;  %v2369_v9 = vld [vmem:[%s2970_s30 + $0x124] ss:$8 sps:$4 sm:$0xff]   ;;  %v2353_v10 = vld [vmem:[%s2970_s30 + $0x20] ss:$8 sps:$4 sm:$0xff]  }
  0x71   : > { %897 = vmatprep.subr.bf16.mxu1 %v2363_v7  ;;  %v2354_v11 = vld [vmem:[%s2970_s30 + $0x34] ss:$8 sps:$4 sm:$0xff]   ;;  %v2371_v12 = vld [vmem:[%s2970_s30 + $0x120] ss:$8 sps:$4 sm:$0xff]   ;;  %v2356_v14 = vld [vmem:[%s2970_s30 + $0x30] ss:$8 sps:$4 sm:$0xff]  }
  0x72   : > { %v2375_v13 = vld [vmem:[%s2970_s30 + $0x134] ss:$8 sps:$4 sm:$0xff]   ;;  %v2360_v15 = vld [vmem:[%s2970_s30 + $0x44] ss:$8 sps:$4 sm:$0xff]   ;;  %v2377_v16 = vld [vmem:[%s2970_s30 + $0x130] ss:$8 sps:$4 sm:$0xff]  }
  0x73   : > { %v2381_v17 = vld [vmem:[%s2970_s30 + $0x144] ss:$8 sps:$4 sm:$0xff]   ;;  %v2362_v18 = vld [vmem:[%s2970_s30 + $0x40] ss:$8 sps:$4 sm:$0xff]   ;;  %v2366_v19 = vld [vmem:[%s2970_s30 + $0x54] ss:$8 sps:$4 sm:$0xff]  }
  0x74   : > { %v2383_v20 = vld [vmem:[%s2970_s30 + $0x140] ss:$8 sps:$4 sm:$0xff]   ;;  %v2387_v21 = vld [vmem:[%s2970_s30 + $0x154] ss:$8 sps:$4 sm:$0xff]   ;;  %v2368_v22 = vld [vmem:[%s2970_s30 + $0x50] ss:$8 sps:$4 sm:$0xff]  }
  0x75   : > { %v2434_v23 = vld [vmem:[#allocation3 + $0x4] ss:$8 sps:$4 sm:$0xff]   ;;  %v2389_v25 = vld [vmem:[%s2970_s30 + $0x150] ss:$8 sps:$4 sm:$0xff]   ;;  %v2374_v27 = vld [vmem:[%s2970_s30 + $0x60] ss:$8 sps:$4 sm:$0xff]  }
  0x76   : > { %v2372_v24 = vld [vmem:[%s2970_s30 + $0x64] ss:$8 sps:$4 sm:$0xff]   ;;  %621 = vmatprep.mubr.bf16.mxu0 %v2434_v23  ;;  %927 = vmatprep.mubr.bf16.mxu1 %v2434_v23  ;;  %v2378_v28 = vld [vmem:[%s2970_s30 + $0x74] ss:$8 sps:$4 sm:$0xff]   ;;  %v2395_v29 = vld [vmem:[%s2970_s30 + $0x160] ss:$8 sps:$4 sm:$0xff]  }
  0x77   : > { %592 = vmatpush1.bf16.xpose.msra.mxu0 %v2350_v5  ;;  %v2393_v26 = vld [vmem:[%s2970_s30 + $0x164] ss:$8 sps:$4 sm:$0xff]   ;;  %v2399_v30 = vld [vmem:[%s2970_s30 + $0x174] ss:$8 sps:$4 sm:$0xff]   ;;  %v2380_v31 = vld [vmem:[%s2970_s30 + $0x70] ss:$8 sps:$4 sm:$0xff]  }
  0x78   : > { %593 = vmatprep.subr.bf16.mxu0 %v2351_v6  ;;  %898 = vmatpush1.bf16.xpose.msra.mxu1 %v2365_v8  ;;  %v2384_v32 = vld [vmem:[%s2970_s30 + $0x84] ss:$8 sps:$4 sm:$0xff]   ;;  %v2401_v33 = vld [vmem:[%s2970_s30 + $0x170] ss:$8 sps:$4 sm:$0xff]   ;;  %v2386_v35 = vld [vmem:[%s2970_s30 + $0x80] ss:$8 sps:$4 sm:$0xff]  }
  0x79   : > { %899 = vmatprep.subr.bf16.mxu1 %v2369_v9  ;;  %v2405_v34 = vld [vmem:[%s2970_s30 + $0x184] ss:$8 sps:$4 sm:$0xff]   ;;  %v2390_v36 = vld [vmem:[%s2970_s30 + $0x94] ss:$8 sps:$4 sm:$0xff]   ;;  %s3014_s25 = scalar_lea.vmem [#allocation8], %s2004_s23  ;;  %p2181_p2 = scmp.ne.s32.totalorder %s2773_s15, 0 }
  0x7a   : > { %v2407_v37 = vld [vmem:[%s2970_s30 + $0x180] ss:$8 sps:$4 sm:$0xff]   ;;  %v2411_v38 = vld [vmem:[%s2970_s30 + $0x194] ss:$8 sps:$4 sm:$0xff]   ;;  %v2392_v39 = vld [vmem:[%s2970_s30 + $0x90] ss:$8 sps:$4 sm:$0xff]  }
  0x7b   : > { %v2396_v40 = vld [vmem:[%s2970_s30 + $0xa4] ss:$8 sps:$4 sm:$0xff]   ;;  %v2413_v41 = vld [vmem:[%s2970_s30 + $0x190] ss:$8 sps:$4 sm:$0xff]   ;;  %v2398_v43 = vld [vmem:[%s2970_s30 + $0xa0] ss:$8 sps:$4 sm:$0xff]  }
  0x7c   : > { %v2417_v42 = vld [vmem:[%s2970_s30 + $0x1a4] ss:$8 sps:$4 sm:$0xff]   ;;  %v2402_v44 = vld [vmem:[%s2970_s30 + $0xb4] ss:$8 sps:$4 sm:$0xff]   ;;  %v2419_v45 = vld [vmem:[%s2970_s30 + $0x1a0] ss:$8 sps:$4 sm:$0xff]  }
  0x7d   : > { %v2423_v46 = vld [vmem:[%s2970_s30 + $0x1b4] ss:$8 sps:$4 sm:$0xff]   ;;  %v2404_v47 = vld [vmem:[%s2970_s30 + $0xb0] ss:$8 sps:$4 sm:$0xff]   ;;  %v2408_v48 = vld [vmem:[%s2970_s30 + $0xc4] ss:$8 sps:$4 sm:$0xff]  }
  0x7e   : > { %v2425_v49 = vld [vmem:[%s2970_s30 + $0x1b0] ss:$8 sps:$4 sm:$0xff]   ;;  %v2429_v50 = vld [vmem:[%s2970_s30 + $0x1c4] ss:$8 sps:$4 sm:$0xff]   ;;  %v2410_v51 = vld [vmem:[%s2970_s30 + $0xc0] ss:$8 sps:$4 sm:$0xff]  }
  0x7f   : > { %594 = vmatpush1.bf16.xpose.msra.mxu0 %v2353_v10  ;;  %v2414_v52 = vld [vmem:[%s2970_s30 + $0xd4] ss:$8 sps:$4 sm:$0xff]   ;;  %v2431_v53 = vld [vmem:[%s2970_s30 + $0x1c0] ss:$8 sps:$4 sm:$0xff]   ;;  %v2416_v55 = vld [vmem:[%s2970_s30 + $0xd0] ss:$8 sps:$4 sm:$0xff]  }
  0x80   : > { %595 = vmatprep.subr.bf16.mxu0 %v2354_v11  ;;  %900 = vmatpush1.bf16.xpose.msra.mxu1 %v2371_v12  ;;  %v2435_v54 = vld [vmem:[%s2970_s30 + $0x1d4] ss:$8 sps:$4 sm:$0xff]   ;;  %v2420_v56 = vld [vmem:[%s2970_s30 + $0xe4] ss:$8 sps:$4 sm:$0xff]   ;;  %v2437_v57 = vld [vmem:[%s2970_s30 + $0x1d0] ss:$8 sps:$4 sm:$0xff]  }
  0x81   : > { %901 = vmatprep.subr.bf16.mxu1 %v2375_v13  ;;  %v2441_v58 = vld [vmem:[%s2970_s30 + $0x1e4] ss:$8 sps:$4 sm:$0xff]   ;;  %v2422_v59 = vld [vmem:[%s2970_s30 + $0xe0] ss:$8 sps:$4 sm:$0xff]   ;;  %v2426_v60 = vld [vmem:[%s2970_s30 + $0xf4] ss:$8 sps:$4 sm:$0xff]  }
  0x82   : > { %v2443_v61 = vld [vmem:[%s2970_s30 + $0x1e0] ss:$8 sps:$4 sm:$0xff]   ;;  %v2447_v62 = vld [vmem:[%s2970_s30 + $0x1f4] ss:$8 sps:$4 sm:$0xff]   ;;  %v2428_v63 = vld [vmem:[%s2970_s30 + $0xf0] ss:$8 sps:$4 sm:$0xff]  }
  0x83   : > { %v2467_v0 = vld [vmem:[%s3014_s25 + $0x4] ss:$8 sps:$4 sm:$0xff]   ;;  %v2449_v1 = vld [vmem:[%s2970_s30 + $0x1f0] ss:$8 sps:$4 sm:$0xff]   ;;  %v2432_v2 = vld [vmem:[#allocation3] ss:$8 sps:$4 sm:$0xff]  }
  0x84   : > { %v2438_v3 = vld [vmem:[#allocation3 + $0x14] ss:$8 sps:$4 sm:$0xff]   ;;  %v2465_v4 = vld [vmem:[%s3014_s25] ss:$8 sps:$4 sm:$0xff]   ;;  %v2440_v6 = vld [vmem:[#allocation3 + $0x10] ss:$8 sps:$4 sm:$0xff]  }
  0x85   : > { %v2470_v5 = vld [vmem:[%s3014_s25 + $0x14] ss:$8 sps:$4 sm:$0xff]   ;;  %v2444_v7 = vld [vmem:[#allocation3 + $0x24] ss:$8 sps:$4 sm:$0xff]   ;;  %v2468_v8 = vld [vmem:[%s3014_s25 + $0x10] ss:$8 sps:$4 sm:$0xff]  }
  0x86   : > { %v2473_v9 = vld [vmem:[%s3014_s25 + $0x24] ss:$8 sps:$4 sm:$0xff]   ;;  %v2446_v10 = vld [vmem:[#allocation3 + $0x20] ss:$8 sps:$4 sm:$0xff]   ;;  %v2450_v11 = vld [vmem:[#allocation3 + $0x34] ss:$8 sps:$4 sm:$0xff]  }
  0x87   : > { %596 = vmatpush1.bf16.xpose.msra.mxu0 %v2356_v14  ;;  %v2471_v12 = vld [vmem:[%s3014_s25 + $0x20] ss:$8 sps:$4 sm:$0xff]   ;;  %v2476_v13 = vld [vmem:[%s3014_s25 + $0x34] ss:$8 sps:$4 sm:$0xff]   ;;  %v2452_v14 = vld [vmem:[#allocation3 + $0x30] ss:$8 sps:$4 sm:$0xff]  }
  0x88   : > { %597 = vmatprep.subr.bf16.mxu0 %v2360_v15  ;;  %902 = vmatpush1.bf16.xpose.msra.mxu1 %v2377_v16  ;;  %v2453_v15 = vld [vmem:[#allocation3 + $0x44] ss:$8 sps:$4 sm:$0xff]   ;;  %v2474_v16 = vld [vmem:[%s3014_s25 + $0x30] ss:$8 sps:$4 sm:$0xff]  }
  0x89   : > { %903 = vmatprep.subr.bf16.mxu1 %v2381_v17  ;;  %v2479_v17 = vld [vmem:[%s3014_s25 + $0x44] ss:$8 sps:$4 sm:$0xff]  }
  0x8a   : > { %v2459_v23 = vld [vmem:[#allocation3 + $0x64] ss:$8 sps:$4 sm:$0xff]  }
  0x8f   : > { %598 = vmatpush1.bf16.xpose.msra.mxu0 %v2362_v18  ;;  %v2455_v18 = vld [vmem:[#allocation3 + $0x40] ss:$8 sps:$4 sm:$0xff]  }
  0x90   : > { %599 = vmatprep.subr.bf16.mxu0 %v2366_v19  ;;  %904 = vmatpush1.bf16.xpose.msra.mxu1 %v2383_v20  ;;  %v2456_v19 = vld [vmem:[#allocation3 + $0x54] ss:$8 sps:$4 sm:$0xff]   ;;  %v2477_v20 = vld [vmem:[%s3014_s25 + $0x40] ss:$8 sps:$4 sm:$0xff]  }
  0x91   : > { %905 = vmatprep.subr.bf16.mxu1 %v2387_v21  ;;  %v2482_v21 = vld [vmem:[%s3014_s25 + $0x54] ss:$8 sps:$4 sm:$0xff]  }
  0x97   : > { %600 = vmatpush1.bf16.xpose.msra.mxu0 %v2368_v22  ;;  %v2458_v22 = vld [vmem:[#allocation3 + $0x50] ss:$8 sps:$4 sm:$0xff]  }
  0x98   : > { %601 = vmatprep.subr.bf16.mxu0 %v2372_v24  ;;  %906 = vmatpush1.bf16.xpose.msra.mxu1 %v2389_v25  ;;  %v2480_v24 = vld [vmem:[%s3014_s25 + $0x50] ss:$8 sps:$4 sm:$0xff]   ;;  %v2485_v25 = vld [vmem:[%s3014_s25 + $0x64] ss:$8 sps:$4 sm:$0xff]  }
  0x99   : > { %907 = vmatprep.subr.bf16.mxu1 %v2393_v26  ;;  %v2461_v26 = vld [vmem:[#allocation3 + $0x60] ss:$8 sps:$4 sm:$0xff]  }
  0x9f   : > { %602 = vmatpush1.bf16.xpose.msra.mxu0 %v2374_v27  ;;  %v2462_v27 = vld [vmem:[#allocation3 + $0x74] ss:$8 sps:$4 sm:$0xff]  }
  0xa0   : > { %603 = vmatprep.subr.bf16.mxu0 %v2378_v28  ;;  %908 = vmatpush1.bf16.xpose.msra.mxu1 %v2395_v29  ;;  %v2483_v28 = vld [vmem:[%s3014_s25 + $0x60] ss:$8 sps:$4 sm:$0xff]   ;;  %v2488_v29 = vld [vmem:[%s3014_s25 + $0x74] ss:$8 sps:$4 sm:$0xff]  }
  0xa1   : > { %909 = vmatprep.subr.bf16.mxu1 %v2399_v30  ;;  %v2464_v30 = vld [vmem:[#allocation3 + $0x70] ss:$8 sps:$4 sm:$0xff]  }
  0xa7   : > { %604 = vmatpush1.bf16.xpose.msra.mxu0 %v2380_v31  ;;  %v2486_v31 = vld [vmem:[%s3014_s25 + $0x70] ss:$8 sps:$4 sm:$0xff]  }
  0xa8   : > { %605 = vmatprep.subr.bf16.mxu0 %v2384_v32  ;;  %910 = vmatpush1.bf16.xpose.msra.mxu1 %v2401_v33  ;;  %v2491_v32 = vld [vmem:[%s3014_s25 + $0x84] ss:$8 sps:$4 sm:$0xff]   ;;  %v2489_v33 = vld [vmem:[%s3014_s25 + $0x80] ss:$8 sps:$4 sm:$0xff]  }
  0xa9   : > { %911 = vmatprep.subr.bf16.mxu1 %v2405_v34  ;;  %v2494_v34 = vld [vmem:[%s3014_s25 + $0x94] ss:$8 sps:$4 sm:$0xff]  }
  0xaf   : > { %606 = vmatpush1.bf16.xpose.msra.mxu0 %v2386_v35  ;;  %v2492_v35 = vld [vmem:[%s3014_s25 + $0x90] ss:$8 sps:$4 sm:$0xff]  }
  0xb0   : > { %607 = vmatprep.subr.bf16.mxu0 %v2390_v36  ;;  %912 = vmatpush1.bf16.xpose.msra.mxu1 %v2407_v37  ;;  %v2497_v36 = vld [vmem:[%s3014_s25 + $0xa4] ss:$8 sps:$4 sm:$0xff]   ;;  %v2495_v37 = vld [vmem:[%s3014_s25 + $0xa0] ss:$8 sps:$4 sm:$0xff]  }
  0xb1   : > { %913 = vmatprep.subr.bf16.mxu1 %v2411_v38  ;;  %v2500_v38 = vld [vmem:[%s3014_s25 + $0xb4] ss:$8 sps:$4 sm:$0xff]  }
  0xb7   : > { %608 = vmatpush1.bf16.xpose.msra.mxu0 %v2392_v39  ;;  %v2498_v39 = vld [vmem:[%s3014_s25 + $0xb0] ss:$8 sps:$4 sm:$0xff]  }
  0xb8   : > { %609 = vmatprep.subr.bf16.mxu0 %v2396_v40  ;;  %914 = vmatpush1.bf16.xpose.msra.mxu1 %v2413_v41  ;;  %v2503_v40 = vld [vmem:[%s3014_s25 + $0xc4] ss:$8 sps:$4 sm:$0xff]   ;;  %v2501_v41 = vld [vmem:[%s3014_s25 + $0xc0] ss:$8 sps:$4 sm:$0xff]  }
  0xb9   : > { %915 = vmatprep.subr.bf16.mxu1 %v2417_v42  ;;  %v2506_v42 = vld [vmem:[%s3014_s25 + $0xd4] ss:$8 sps:$4 sm:$0xff]  }
  0xbf   : > { %610 = vmatpush1.bf16.xpose.msra.mxu0 %v2398_v43  ;;  %v2504_v43 = vld [vmem:[%s3014_s25 + $0xd0] ss:$8 sps:$4 sm:$0xff]  }
  0xc0   : > { %611 = vmatprep.subr.bf16.mxu0 %v2402_v44  ;;  %916 = vmatpush1.bf16.xpose.msra.mxu1 %v2419_v45  ;;  %v2509_v44 = vld [vmem:[%s3014_s25 + $0xe4] ss:$8 sps:$4 sm:$0xff]   ;;  %v2507_v45 = vld [vmem:[%s3014_s25 + $0xe0] ss:$8 sps:$4 sm:$0xff]  }
  0xc1   : > { %917 = vmatprep.subr.bf16.mxu1 %v2423_v46  ;;  %v2512_v46 = vld [vmem:[%s3014_s25 + $0xf4] ss:$8 sps:$4 sm:$0xff]  }
  0xc7   : > { %612 = vmatpush1.bf16.xpose.msra.mxu0 %v2404_v47  ;;  %v2510_v47 = vld [vmem:[%s3014_s25 + $0xf0] ss:$8 sps:$4 sm:$0xff]  }
  0xc8   : > { %613 = vmatprep.subr.bf16.mxu0 %v2408_v48  ;;  %918 = vmatpush1.bf16.xpose.msra.mxu1 %v2425_v49 }
  0xc9   : > { %919 = vmatprep.subr.bf16.mxu1 %v2429_v50 }
  0xcf   : > { %614 = vmatpush1.bf16.xpose.msra.mxu0 %v2410_v51 }
  0xd0   : > { %615 = vmatprep.subr.bf16.mxu0 %v2414_v52  ;;  %920 = vmatpush1.bf16.xpose.msra.mxu1 %v2431_v53 }
  0xd1   : > { %921 = vmatprep.subr.bf16.mxu1 %v2435_v54 }
  0xd7   : > { %616 = vmatpush1.bf16.xpose.msra.mxu0 %v2416_v55 }
  0xd8   : > { %617 = vmatprep.subr.bf16.mxu0 %v2420_v56  ;;  %922 = vmatpush1.bf16.xpose.msra.mxu1 %v2437_v57 }
  0xd9   : > { %923 = vmatprep.subr.bf16.mxu1 %v2441_v58 }
  0xdf   : > { %618 = vmatpush1.bf16.xpose.msra.mxu0 %v2422_v59 }
  0xe0   : > { %619 = vmatprep.subr.bf16.mxu0 %v2426_v60  ;;  %924 = vmatpush1.bf16.xpose.msra.mxu1 %v2443_v61 }
  0xe1   : > { %925 = vmatprep.subr.bf16.mxu1 %v2447_v62 }
  0xe7   : > { %620 = vmatpush1.bf16.xpose.msra.mxu0 %v2428_v63 }
  0xe8   : > { %1472 = vmatprep.subr.bf16.mxu0 %v2467_v0  ;;  %926 = vmatpush1.bf16.xpose.msra.mxu1 %v2449_v1 }
  0xe9   : > { %2223 = vmatprep.subr.bf16.mxu1 %v2467_v0 }
  0xee   : > { %622 = vmatmul.mubr.bf16.vlgmr.msra.gmra.mrb[0].mxu0 %v2432_v2 }
  0xef   : > { %631 = vmatprep.mubr.bf16.mxu0 %v2438_v3  ;;  %1473 = vmatpush1.bf16.xpose.msra.mxu0 %v2465_v4 }
  0xf0   : > { %1474 = vmatprep.subr.bf16.mxu0 %v2470_v5  ;;  %928 = vmatmul.mubr.bf16.vlgmr.msra.gmra.mrb[0].mxu1 %v2432_v2 }
  0xf1   : > { %937 = vmatprep.mubr.bf16.mxu1 %v2438_v3  ;;  %2239 = vmatpush1.bf16.xpose.msra.mxu1 %v2465_v4 }
  0xf2   : > { %2224 = vmatprep.subr.bf16.mxu1 %v2470_v5 }
  0xf6   : > { %632 = vmatmul.mubr.bf16.gmra.mrb[4].mxu0 %v2440_v6 }
  0xf7   : > { %641 = vmatprep.mubr.bf16.mxu0 %v2444_v7  ;;  %1475 = vmatpush1.bf16.xpose.msra.mxu0 %v2468_v8 }
  0xf8   : > { %1476 = vmatprep.subr.bf16.mxu0 %v2473_v9  ;;  %938 = vmatmul.mubr.bf16.gmra.mrb[4].mxu1 %v2440_v6 }
  0xf9   : > { %947 = vmatprep.mubr.bf16.mxu1 %v2444_v7  ;;  %2240 = vmatpush1.bf16.xpose.msra.mxu1 %v2468_v8 }
  0xfa   : > { %2225 = vmatprep.subr.bf16.mxu1 %v2473_v9 }
  0xfe   : > { %642 = vmatmul.mubr.bf16.gmra.mrb[8].mxu0 %v2446_v10 }
  0xff   : > { %651 = vmatprep.mubr.bf16.mxu0 %v2450_v11  ;;  %1477 = vmatpush1.bf16.xpose.msra.mxu0 %v2471_v12 }
 0x100   : > { %1478 = vmatprep.subr.bf16.mxu0 %v2476_v13  ;;  %948 = vmatmul.mubr.bf16.gmra.mrb[8].mxu1 %v2446_v10 }
 0x101   : > { %957 = vmatprep.mubr.bf16.mxu1 %v2450_v11  ;;  %2241 = vmatpush1.bf16.xpose.msra.mxu1 %v2471_v12 }
 0x102   : > { %2226 = vmatprep.subr.bf16.mxu1 %v2476_v13 }
 0x106   : > { %652 = vmatmul.mubr.bf16.gmra.mrb[12].mxu0 %v2452_v14 }
 0x107   : > { %661 = vmatprep.mubr.bf16.mxu0 %v2453_v15  ;;  %1479 = vmatpush1.bf16.xpose.msra.mxu0 %v2474_v16 }
 0x108   : > { %1480 = vmatprep.subr.bf16.mxu0 %v2479_v17  ;;  %958 = vmatmul.mubr.bf16.gmra.mrb[12].mxu1 %v2452_v14 }
 0x109   : > { %967 = vmatprep.mubr.bf16.mxu1 %v2453_v15  ;;  %2242 = vmatpush1.bf16.xpose.msra.mxu1 %v2474_v16 }
 0x10a   : > { %2227 = vmatprep.subr.bf16.mxu1 %v2479_v17 }
 0x10e   : > { %662 = vmatmul.mubr.bf16.gmra.mrb[16].mxu0 %v2455_v18 }
 0x10f   : > { %671 = vmatprep.mubr.bf16.mxu0 %v2456_v19  ;;  %1481 = vmatpush1.bf16.xpose.msra.mxu0 %v2477_v20 }
 0x110   : > { %1482 = vmatprep.subr.bf16.mxu0 %v2482_v21  ;;  %968 = vmatmul.mubr.bf16.gmra.mrb[16].mxu1 %v2455_v18 }
 0x111   : > { %977 = vmatprep.mubr.bf16.mxu1 %v2456_v19  ;;  %2243 = vmatpush1.bf16.xpose.msra.mxu1 %v2477_v20 }
 0x112   : > { %2228 = vmatprep.subr.bf16.mxu1 %v2482_v21 }
 0x116   : > { %672 = vmatmul.mubr.bf16.gmra.mrb[20].mxu0 %v2458_v22 }
 0x117   : > { %681 = vmatprep.mubr.bf16.mxu0 %v2459_v23  ;;  %1483 = vmatpush1.bf16.xpose.msra.mxu0 %v2480_v24 }
 0x118   : > { %1484 = vmatprep.subr.bf16.mxu0 %v2485_v25  ;;  %978 = vmatmul.mubr.bf16.gmra.mrb[20].mxu1 %v2458_v22 }
 0x119   : > { %987 = vmatprep.mubr.bf16.mxu1 %v2459_v23  ;;  %2244 = vmatpush1.bf16.xpose.msra.mxu1 %v2480_v24 }
 0x11a   : > { %2229 = vmatprep.subr.bf16.mxu1 %v2485_v25 }
 0x11e   : > { %682 = vmatmul.mubr.bf16.gmra.mrb[24].mxu0 %v2461_v26 }
 0x11f   : > { %691 = vmatprep.mubr.bf16.mxu0 %v2462_v27  ;;  %1485 = vmatpush1.bf16.xpose.msra.mxu0 %v2483_v28 }
 0x120   : > { %1486 = vmatprep.subr.bf16.mxu0 %v2488_v29  ;;  %988 = vmatmul.mubr.bf16.gmra.mrb[24].mxu1 %v2461_v26 }
 0x121   : > { %997 = vmatprep.mubr.bf16.mxu1 %v2462_v27  ;;  %2245 = vmatpush1.bf16.xpose.msra.mxu1 %v2483_v28 }
 0x122   : > { %2230 = vmatprep.subr.bf16.mxu1 %v2488_v29 }
 0x126   : > { %692 = vmatmul.mubr.bf16.gmra.mrb[28].mxu0 %v2464_v30 }
 0x127   : > { %1487 = vmatpush1.bf16.xpose.msra.mxu0 %v2486_v31 }
 0x128   : > { %1488 = vmatprep.subr.bf16.mxu0 %v2491_v32  ;;  %998 = vmatmul.mubr.bf16.gmra.mrb[28].mxu1 %v2464_v30 }
 0x129   : > { %2246 = vmatpush1.bf16.xpose.msra.mxu1 %v2486_v31 }
 0x12a   : > { %2231 = vmatprep.subr.bf16.mxu1 %v2491_v32 }
 0x12f   : > { %1489 = vmatpush1.bf16.xpose.msra.mxu0 %v2489_v33 }
 0x130   : > { %1490 = vmatprep.subr.bf16.mxu0 %v2494_v34 }
 0x131   : > { %2247 = vmatpush1.bf16.xpose.msra.mxu1 %v2489_v33 }
 0x132   : > { %2232 = vmatprep.subr.bf16.mxu1 %v2494_v34 }
 0x137   : > { %1491 = vmatpush1.bf16.xpose.msra.mxu0 %v2492_v35 }
 0x138   : > { %1492 = vmatprep.subr.bf16.mxu0 %v2497_v36 }
 0x139   : > { %2248 = vmatpush1.bf16.xpose.msra.mxu1 %v2492_v35 }
 0x13a   : > { %2233 = vmatprep.subr.bf16.mxu1 %v2497_v36 }
 0x13f   : > { %1493 = vmatpush1.bf16.xpose.msra.mxu0 %v2495_v37 }
 0x140   : > { %1494 = vmatprep.subr.bf16.mxu0 %v2500_v38 }
 0x141   : > { %2249 = vmatpush1.bf16.xpose.msra.mxu1 %v2495_v37 }
 0x142   : > { %2234 = vmatprep.subr.bf16.mxu1 %v2500_v38 }
 0x147   : > { %1495 = vmatpush1.bf16.xpose.msra.mxu0 %v2498_v39 }
 0x148   : > { %1496 = vmatprep.subr.bf16.mxu0 %v2503_v40 }
 0x149   : > { %2250 = vmatpush1.bf16.xpose.msra.mxu1 %v2498_v39 }
 0x14a   : > { %2235 = vmatprep.subr.bf16.mxu1 %v2503_v40 }
 0x14f   : > { %1497 = vmatpush1.bf16.xpose.msra.mxu0 %v2501_v41 }
 0x150   : > { %1498 = vmatprep.subr.bf16.mxu0 %v2506_v42 }
 0x151   : > { %2251 = vmatpush1.bf16.xpose.msra.mxu1 %v2501_v41 }
 0x152   : > { %2236 = vmatprep.subr.bf16.mxu1 %v2506_v42 }
 0x157   : > { %1499 = vmatpush1.bf16.xpose.msra.mxu0 %v2504_v43 }
 0x158   : > { %1500 = vmatprep.subr.bf16.mxu0 %v2509_v44 }
 0x159   : > { %2252 = vmatpush1.bf16.xpose.msra.mxu1 %v2504_v43 }
 0x15a   : > { %2237 = vmatprep.subr.bf16.mxu1 %v2509_v44 }
 0x15f   : > { %1501 = vmatpush1.bf16.xpose.msra.mxu0 %v2507_v45 }
 0x160   : > { %1502 = vmatprep.subr.bf16.mxu0 %v2512_v46 }
 0x161   : > { %2253 = vmatpush1.bf16.xpose.msra.mxu1 %v2507_v45 }
 0x162   : > { %2238 = vmatprep.subr.bf16.mxu1 %v2512_v46 }
 0x167   : > { %1503 = vmatpush1.bf16.xpose.msra.mxu0 %v2510_v47 }
 0x169   : > { %2254 = vmatpush1.bf16.xpose.msra.mxu1 %v2510_v47 }
 0x1c1   : > { %v3076_v48 = vpop.f32.mrb[0].mxu0 }
 0x1c2   : > { %v2117_v49 = vmul.f32 -1.442695, %v3076_v48  ;;  %v3079_v50 = vpop.f32.mrb[1].mxu0 }
 0x1c3   : > { %v2118_v51 = vmul.f32 -1.442695, %v3079_v50  ;;  %v3082_v52 = vpop.f32.mrb[2].mxu0  ;;  %v3088_v56 = vpop.f32.mrb[0].mxu1 }
 0x1c4   : > { %2513 = vpow2.f32 %v2117_v49  ;;  %v2119_v53 = vmul.f32 -1.442695, %v3082_v52  ;;  %v3085_v54 = vpop.f32.mrb[3].mxu0  ;;  %v3090_v57 = vpop.f32.mrb[1].mxu1 }
 0x1c5   : > { %2515 = vpow2.f32 %v2118_v51  ;;  %v2120_v55 = vmul.f32 -1.442695, %v3085_v54  ;;  %v3094_v59 = vpop.f32.mrb[2].mxu1 }
 0x1c6   : > { %2517 = vpow2.f32 %v2119_v53  ;;  %v3099_v62 = vpop.f32.mrb[3].mxu1 }
 0x1c7   : > { %2519 = vpow2.f32 %v2120_v55 }
 0x1c9   : > { %v3092_v58 = vpop.f32.mrb[4].mxu0 }
 0x1ca   : > { %v2121_v60 = vmul.f32 -1.442695, %v3092_v58  ;;  %v3097_v61 = vpop.f32.mrb[5].mxu0 }
 0x1cb   : > { %v2122_v63 = vmul.f32 -1.442695, %v3097_v61  ;;  %v3102_v0 = vpop.f32.mrb[6].mxu0  ;;  %v3108_v7 = vpop.f32.mrb[4].mxu1 }
 0x1cc   : > { %2521 = vpow2.f32 %v2121_v60  ;;  %v2123_v1 = vmul.f32 -1.442695, %v3102_v0  ;;  %v3105_v2 = vpop.f32.mrb[7].mxu0  ;;  %v3110_v10 = vpop.f32.mrb[5].mxu1 }
 0x1cd   : > { %2523 = vpow2.f32 %v2122_v63  ;;  %v2124_v3 = vmul.f32 -1.442695, %v3105_v2  ;;  %v3114_v14 = vpop.f32.mrb[6].mxu1 }
 0x1ce   : > { %v2514_v4 = vpop.eup %2513  ;;  %2525 = vpow2.f32 %v2123_v1  ;;  %v3119_v18 = vpop.f32.mrb[7].mxu1 }
 0x1cf   : > { %v2516_v5 = vpop.eup %2515  ;;  %v1104_v6 = vadd.f32 1.0, %v2514_v4  ;;  %2527 = vpow2.f32 %v2124_v3 }
 0x1d0   : > { %v2518_v8 = vpop.eup %2517  ;;  %v1105_v9 = vadd.f32 1.0, %v2516_v5 }
 0x1d1   : > { %v2520_v11 = vpop.eup %2519  ;;  %2529 = vrcp.f32 %v1104_v6  ;;  %v1106_v12 = vadd.f32 1.0, %v2518_v8  ;;  %v3112_v13 = vpop.f32.mrb[8].mxu0 }
 0x1d2   : > { %2531 = vrcp.f32 %v1105_v9  ;;  %v1107_v15 = vadd.f32 1.0, %v2520_v11  ;;  %v2125_v16 = vmul.f32 -1.442695, %v3112_v13  ;;  %v3117_v17 = vpop.f32.mrb[9].mxu0 }
 0x1d3   : > { %2533 = vrcp.f32 %v1106_v12  ;;  %v2126_v19 = vmul.f32 -1.442695, %v3117_v17  ;;  %v3122_v20 = vpop.f32.mrb[10].mxu0  ;;  %v3128_v27 = vpop.f32.mrb[8].mxu1 }
 0x1d4   : > { %2535 = vrcp.f32 %v1107_v15  ;;  %v2127_v21 = vmul.f32 -1.442695, %v3122_v20  ;;  %v3125_v22 = vpop.f32.mrb[11].mxu0  ;;  %v3130_v30 = vpop.f32.mrb[9].mxu1 }
 0x1d5   : > { %2537 = vpow2.f32 %v2125_v16  ;;  %v2128_v23 = vmul.f32 -1.442695, %v3125_v22  ;;  %v3134_v34 = vpop.f32.mrb[10].mxu1 }
 0x1d6   : > { %v2522_v24 = vpop.eup %2521  ;;  %2539 = vpow2.f32 %v2126_v19  ;;  %v3139_v38 = vpop.f32.mrb[11].mxu1 }
 0x1d7   : > { %v2524_v25 = vpop.eup %2523  ;;  %v1108_v26 = vadd.f32 1.0, %v2522_v24  ;;  %2541 = vpow2.f32 %v2127_v21 }
 0x1d8   : > { %v2526_v28 = vpop.eup %2525  ;;  %v1109_v29 = vadd.f32 1.0, %v2524_v25  ;;  %2543 = vpow2.f32 %v2128_v23 }
 0x1d9   : > { %v2528_v31 = vpop.eup %2527  ;;  %2545 = vrcp.f32 %v1108_v26  ;;  %v1110_v32 = vadd.f32 1.0, %v2526_v28  ;;  %v3132_v33 = vpop.f32.mrb[12].mxu0 }
 0x1da   : > { %2547 = vrcp.f32 %v1109_v29  ;;  %v1111_v35 = vadd.f32 1.0, %v2528_v31  ;;  %v2129_v36 = vmul.f32 -1.442695, %v3132_v33  ;;  %v3137_v37 = vpop.f32.mrb[13].mxu0 }
 0x1db   : > { %v2530_v39 = vpop.eup %2529  ;;  %2549 = vrcp.f32 %v1110_v32  ;;  %v2130_v40 = vmul.f32 -1.442695, %v3137_v37  ;;  %v3142_v41 = vpop.f32.mrb[14].mxu0 }
 0x1dc   : > { %v2532_v42 = vpop.eup %2531  ;;  %v1200_v43 = vmul.f32 %v2530_v39, %v3076_v48  ;;  %2551 = vrcp.f32 %v1111_v35  ;;  %v2131_v44 = vmul.f32 -1.442695, %v3142_v41  ;;  %v3146_v45 = vpop.f32.mrb[15].mxu0 }
 0x1dd   : > { %v2534_v46 = vpop.eup %2533  ;;  %v1201_v47 = vmul.f32 %v2532_v42, %v3079_v50  ;;  %2553 = vpow2.f32 %v2129_v36  ;;  %v2132_v49 = vmul.f32 -1.442695, %v3146_v45  ;;  %v3154_v1 = vpop.f32.mrb[12].mxu1 }
 0x1de   : > { %v2536_v51 = vpop.eup %2535  ;;  %v1202_v53 = vmul.f32 %v2534_v46, %v3082_v52  ;;  %2555 = vpow2.f32 %v2130_v40  ;;  %v1232_v55 = vmul.f32 %v1200_v43, %v3088_v56  ;;  %v3157_v5 = vpop.f32.mrb[13].mxu1 }
 0x1df   : > { %v2538_v60 = vpop.eup %2537  ;;  %v1203_v48 = vmul.f32 %v2536_v51, %v3085_v54  ;;  %2557 = vpow2.f32 %v2131_v44  ;;  %v1233_v63 = vmul.f32 %v1201_v47, %v3090_v57  ;;  %v3162_v9 = vpop.f32.mrb[14].mxu1 }
 0x1e0   : > { %v2540_v3 = vpop.eup %2539  ;;  %v1112_v4 = vadd.f32 1.0, %v2538_v60  ;;  %2559 = vpow2.f32 %v2132_v49  ;;  %v1234_v50 = vmul.f32 %v1202_v53, %v3094_v59  ;;  %v3167_v16 = vpop.f32.mrb[15].mxu1 }
 0x1e1   : > { %v2542_v6 = vpop.eup %2541  ;;  %v1113_v52 = vadd.f32 1.0, %v2540_v3  ;;  %v1235_v8 = vmul.f32 %v1203_v48, %v3099_v62  ;;  %v3160_v56 = vpop.f32.mrb[16].mxu0 }
 0x1e2   : > { %v2544_v54 = vpop.eup %2543  ;;  %2561 = vrcp.f32 %v1112_v4  ;;  %v1114_v57 = vadd.f32 1.0, %v2542_v6  ;;  %v1264_v11 = vpack.c.bf16 %v1234_v50, %v1232_v55  ;;  %v2133_v12 = vmul.f32 -1.442695, %v3160_v56  ;;  %v3165_v15 = vpop.f32.mrb[17].mxu0 }
 0x1e3   : > { %v2546_v59 = vpop.eup %2545  ;;  %2563 = vrcp.f32 %v1113_v52  ;;  %v1115_v19 = vadd.f32 1.0, %v2544_v54  ;;  %v1265_v21 = vpack.c.bf16 %v1235_v8, %v1233_v63  ;;  %v2134_v62 = vmul.f32 -1.442695, %v3165_v15  ;;  %v3170_v23 = vpop.f32.mrb[18].mxu0 }
 0x1e4   : > { %v2548_v24 = vpop.eup %2547  ;;  %v1204_v25 = vmul.f32 %v2546_v59, %v3092_v58  ;;  %2565 = vrcp.f32 %v1114_v57  ;;  %v2135_v26 = vmul.f32 -1.442695, %v3170_v23  ;;  %v3174_v28 = vpop.f32.mrb[19].mxu0 }
 0x1e5   : > { %v2550_v29 = vpop.eup %2549  ;;  %v1205_v31 = vmul.f32 %v2548_v24, %v3097_v61  ;;  %2567 = vrcp.f32 %v1115_v19  ;;  %v2136_v32 = vmul.f32 -1.442695, %v3174_v28  ;;  %1504 = vmatprep.mubr.bf16.mxu0 %v1265_v21  ;;  %v3182_v43 = vpop.f32.mrb[16].mxu1 }
 0x1e6   : > { %v2552_v35 = vpop.eup %2551  ;;  %v1206_v36 = vmul.f32 %v2550_v29, %v3102_v0  ;;  %2569 = vpow2.f32 %v2133_v12  ;;  %v1236_v39 = vmul.f32 %v1204_v25, %v3108_v7  ;;  %1505 = vmatmul.mubr.bf16.vlgmr.msra.gmra.mrb[32].mxu0 %v1264_v11  ;;  %v3185_v47 = vpop.f32.mrb[17].mxu1 }
 0x1e7   : > { %v2554_v58 = vpop.eup %2553  ;;  %v1207_v40 = vmul.f32 %v2552_v35, %v3105_v2  ;;  %2571 = vpow2.f32 %v2134_v62  ;;  %v1237_v42 = vmul.f32 %v1205_v31, %v3110_v10  ;;  %v3190_v2 = vpop.f32.mrb[18].mxu1 }
 0x1e8   : > { %v2556_v61 = vpop.eup %2555  ;;  %v1116_v44 = vadd.f32 1.0, %v2554_v58  ;;  %2573 = vpow2.f32 %v2135_v26  ;;  %v1238_v46 = vmul.f32 %v1206_v36, %v3114_v14  ;;  %v3195_v14 = vpop.f32.mrb[19].mxu1 }
 0x1e9   : > { %v2558_v0 = vpop.eup %2557  ;;  %v1117_v49 = vadd.f32 1.0, %v2556_v61  ;;  %2575 = vpow2.f32 %v2136_v32  ;;  %v1239_v7 = vmul.f32 %v1207_v40, %v3119_v18  ;;  %v3188_v51 = vpop.f32.mrb[20].mxu0 }
 0x1ea   : > { %v2560_v53 = vpop.eup %2559  ;;  %2577 = vrcp.f32 %v1116_v44  ;;  %v1118_v10 = vadd.f32 1.0, %v2558_v0  ;;  %v1266_v55 = vpack.c.bf16 %v1238_v46, %v1236_v39  ;;  %v2137_v60 = vmul.f32 -1.442695, %v3188_v51  ;;  %v3193_v48 = vpop.f32.mrb[21].mxu0 }
 0x1eb   : > { %2579 = vrcp.f32 %v1117_v49  ;;  %v1119_v63 = vadd.f32 1.0, %v2560_v53  ;;  %v1267_v3 = vpack.c.bf16 %v1239_v7, %v1237_v42  ;;  %v2138_v4 = vmul.f32 -1.442695, %v3193_v48  ;;  %v3198_v18 = vpop.f32.mrb[22].mxu0  ;;  %v3208_v62 = vpop.f32.mrb[20].mxu1 }
 0x1ec   : > { %v2562_v50 = vpop.eup %2561  ;;  %2581 = vrcp.f32 %v1118_v10  ;;  %v2139_v6 = vmul.f32 -1.442695, %v3198_v18  ;;  %v3201_v52 = vpop.f32.mrb[23].mxu0 }
 0x1ed   : > { %v2564_v8 = vpop.eup %2563  ;;  %v1208_v54 = vmul.f32 %v2562_v50, %v3112_v13  ;;  %2583 = vrcp.f32 %v1119_v63  ;;  %v2140_v57 = vmul.f32 -1.442695, %v3201_v52  ;;  %1514 = vmatprep.mubr.bf16.mxu0 %v1267_v3  ;;  %v3212_v26 = vpop.f32.mrb[21].mxu1 }
 0x1ee   : > { %v2566_v11 = vpop.eup %2565  ;;  %v1209_v12 = vmul.f32 %v2564_v8, %v3117_v17  ;;  %2585 = vpow2.f32 %v2137_v60  ;;  %1515 = vmatmul.mubr.bf16.gmra.mrb[36].mxu0 %v1266_v55 }
 0x1ef   : > { %v2568_v59 = vpop.eup %2567  ;;  %v1210_v19 = vmul.f32 %v2566_v11, %v3122_v20  ;;  %2587 = vpow2.f32 %v2138_v4  ;;  %v1240_v21 = vmul.f32 %v1208_v54, %v3128_v27  ;;  %v3217_v20 = vpop.f32.mrb[22].mxu1 }
 0x1f0   : > { %v2570_v24 = vpop.eup %2569  ;;  %v1211_v13 = vmul.f32 %v2568_v59, %v3125_v22  ;;  %2589 = vpow2.f32 %v2139_v6  ;;  %v1241_v25 = vmul.f32 %v1209_v12, %v3130_v30  ;;  %v3222_v22 = vpop.f32.mrb[23].mxu1 }
 0x1f1   : > { %v2572_v29 = vpop.eup %2571  ;;  %v1120_v17 = vadd.f32 1.0, %v2570_v24  ;;  %2591 = vpow2.f32 %v2140_v57  ;;  %v1242_v31 = vmul.f32 %v1210_v19, %v3134_v34  ;;  %v3215_v32 = vpop.f32.mrb[24].mxu0 }
 0x1f2   : > { %v2574_v27 = vpop.eup %2573  ;;  %v1121_v35 = vadd.f32 1.0, %v2572_v29  ;;  %v1243_v36 = vmul.f32 %v1211_v13, %v3139_v38  ;;  %v3220_v39 = vpop.f32.mrb[25].mxu0  ;;  %v2141_v42 = vmul.f32 -1.442695, %v3215_v32 }
 0x1f3   : > { %v2576_v30 = vpop.eup %2575  ;;  %2593 = vrcp.f32 %v1120_v17  ;;  %v1122_v58 = vadd.f32 1.0, %v2574_v27  ;;  %v1268_v40 = vpack.c.bf16 %v1242_v31, %v1240_v21  ;;  %v3225_v61 = vpop.f32.mrb[26].mxu0  ;;  %v2142_v0 = vmul.f32 -1.442695, %v3220_v39 }
 0x1f4   : > { %v2578_v34 = vpop.eup %2577  ;;  %2595 = vrcp.f32 %v1121_v35  ;;  %v1123_v44 = vadd.f32 1.0, %v2576_v30  ;;  %v1269_v46 = vpack.c.bf16 %v1243_v36, %v1241_v25  ;;  %v3228_v49 = vpop.f32.mrb[27].mxu0  ;;  %v2143_v53 = vmul.f32 -1.442695, %v3225_v61 }
 0x1f5   : > { %v2580_v38 = vpop.eup %2579  ;;  %v1212_v7 = vmul.f32 %v2578_v34, %v3132_v33  ;;  %2597 = vrcp.f32 %v1122_v58  ;;  %v2144_v60 = vmul.f32 -1.442695, %v3228_v49  ;;  %v3236_v50 = vpop.f32.mrb[24].mxu1 }
 0x1f6   : > { %v2582_v10 = vpop.eup %2581  ;;  %v1213_v55 = vmul.f32 %v2580_v38, %v3137_v37  ;;  %2599 = vrcp.f32 %v1123_v44  ;;  %1524 = vmatprep.mubr.bf16.mxu0 %v1269_v46  ;;  %v3240_v37 = vpop.f32.mrb[25].mxu1 }
 0x1f7   : > { %v2584_v63 = vpop.eup %2583  ;;  %v1214_v3 = vmul.f32 %v2582_v10, %v3142_v41  ;;  %2601 = vpow2.f32 %v2141_v42  ;;  %v1244_v4 = vmul.f32 %v1212_v7, %v3154_v1  ;;  %1525 = vmatmul.mubr.bf16.gmra.mrb[40].mxu0 %v1268_v40  ;;  %v3245_v12 = vpop.f32.mrb[26].mxu1 }
 0x1f8   : > { %v2586_v33 = vpop.eup %2585  ;;  %v1215_v6 = vmul.f32 %v2584_v63, %v3146_v45  ;;  %2603 = vpow2.f32 %v2142_v0  ;;  %v1245_v8 = vmul.f32 %v1213_v55, %v3157_v5  ;;  %v3250_v21 = vpop.f32.mrb[27].mxu1 }
 0x1f9   : > { %v2588_v54 = vpop.eup %2587  ;;  %v1124_v57 = vadd.f32 1.0, %v2586_v33  ;;  %2605 = vpow2.f32 %v2143_v53  ;;  %v1246_v11 = vmul.f32 %v1214_v3, %v3162_v9  ;;  %v3243_v41 = vpop.f32.mrb[28].mxu0 }
 0x1fa   : > { %v2590_v1 = vpop.eup %2589  ;;  %v1125_v59 = vadd.f32 1.0, %v2588_v54  ;;  %2607 = vpow2.f32 %v2144_v60  ;;  %v1247_v19 = vmul.f32 %v1215_v6, %v3167_v16  ;;  %v3248_v45 = vpop.f32.mrb[29].mxu0  ;;  %v2145_v25 = vmul.f32 -1.442695, %v3243_v41 }
 0x1fb   : > { %v2592_v5 = vpop.eup %2591  ;;  %2609 = vrcp.f32 %v1124_v57  ;;  %v1126_v24 = vadd.f32 1.0, %v2590_v1  ;;  %v1270_v13 = vpack.c.bf16 %v1246_v11, %v1244_v4  ;;  %v3253_v9 = vpop.f32.mrb[30].mxu0  ;;  %v2146_v31 = vmul.f32 -1.442695, %v3248_v45 }
 0x1fc   : > { %2611 = vrcp.f32 %v1125_v59  ;;  %v1127_v29 = vadd.f32 1.0, %v2592_v5  ;;  %v1271_v17 = vpack.c.bf16 %v1247_v19, %v1245_v8  ;;  %v3256_v27 = vpop.f32.mrb[31].mxu0  ;;  %v2147_v35 = vmul.f32 -1.442695, %v3253_v9  ;;  %v3262_v34 = vpop.f32.mrb[28].mxu1 }
 0x1fd   : > { %v2594_v16 = vpop.eup %2593  ;;  %2613 = vrcp.f32 %v1126_v24  ;;  %v2148_v58 = vmul.f32 -1.442695, %v3256_v27  ;;  %v3266_v38 = vpop.f32.mrb[29].mxu1 }
 0x1fe   : > { %v2596_v36 = vpop.eup %2595  ;;  %v1216_v30 = vmul.f32 %v2594_v16, %v3160_v56  ;;  %2615 = vrcp.f32 %v1127_v29  ;;  %1534 = vmatprep.mubr.bf16.mxu0 %v1271_v17  ;;  %v3270_v10 = vpop.f32.mrb[30].mxu1 }
 0x1ff   : > { %v2598_v40 = vpop.eup %2597  ;;  %v1217_v42 = vmul.f32 %v2596_v36, %v3165_v15  ;;  %2617 = vpow2.f32 %v2145_v25  ;;  %1535 = vmatmul.mubr.bf16.gmra.mrb[44].mxu0 %v1270_v13  ;;  %v3273_v63 = vpop.f32.mrb[31].mxu1 }
 0x200   : > { %v2600_v44 = vpop.eup %2599  ;;  %v1218_v46 = vmul.f32 %v2598_v40, %v3170_v23  ;;  %2619 = vpow2.f32 %v2146_v31  ;;  %v1248_v0 = vmul.f32 %v1216_v30, %v3182_v43 }
 0x201   : > { %v2602_v56 = vpop.eup %2601  ;;  %v1219_v7 = vmul.f32 %v2600_v44, %v3174_v28  ;;  %2621 = vpow2.f32 %v2147_v35  ;;  %v1249_v53 = vmul.f32 %v1217_v42, %v3185_v47 }
 0x202   : > { %v2604_v15 = vpop.eup %2603  ;;  %v1128_v55 = vadd.f32 1.0, %v2602_v56  ;;  %2623 = vpow2.f32 %v2148_v58  ;;  %v1250_v60 = vmul.f32 %v1218_v46, %v3190_v2 }
 0x203   : > { %v2606_v23 = vpop.eup %2605  ;;  %v1129_v3 = vadd.f32 1.0, %v2604_v15  ;;  %v1251_v43 = vmul.f32 %v1219_v7, %v3195_v14 }
 0x204   : > { %v2608_v4 = vpop.eup %2607  ;;  %2625 = vrcp.f32 %v1128_v55  ;;  %v1130_v33 = vadd.f32 1.0, %v2606_v23  ;;  %v1272_v28 = vpack.c.bf16 %v1250_v60, %v1248_v0 }
 0x205   : > { %v2610_v6 = vpop.eup %2609  ;;  %2627 = vrcp.f32 %v1129_v3  ;;  %v1131_v47 = vadd.f32 1.0, %v2608_v4  ;;  %v1273_v8 = vpack.c.bf16 %v1251_v43, %v1249_v53 }
 0x206   : > { %v2612_v54 = vpop.eup %2611  ;;  %v1220_v57 = vmul.f32 %v2610_v6, %v3188_v51  ;;  %2629 = vrcp.f32 %v1130_v33 }
 0x207   : > { %v2614_v11 = vpop.eup %2613  ;;  %v1221_v2 = vmul.f32 %v2612_v54, %v3193_v48  ;;  %2631 = vrcp.f32 %v1131_v47  ;;  %1544 = vmatprep.mubr.bf16.mxu1 %v1273_v8 }
 0x208   : > { %v2616_v1 = vpop.eup %2615  ;;  %v1222_v14 = vmul.f32 %v2614_v11, %v3198_v18  ;;  %v1252_v59 = vmul.f32 %v1220_v57, %v3208_v62  ;;  %1545 = vmatmul.mubr.bf16.vlgmr.msra.gmra.mrb[32].mxu1 %v1272_v28 }
 0x209   : > { %v2618_v19 = vpop.eup %2617  ;;  %v1223_v5 = vmul.f32 %v2616_v1, %v3201_v52  ;;  %v1253_v24 = vmul.f32 %v1221_v2, %v3212_v26 }
 0x20a   : > { %v2620_v13 = vpop.eup %2619  ;;  %v1132_v25 = vadd.f32 1.0, %v2618_v19  ;;  %v1254_v51 = vmul.f32 %v1222_v14, %v3217_v20 }
 0x20b   : > { %v2622_v29 = vpop.eup %2621  ;;  %v1133_v17 = vadd.f32 1.0, %v2620_v13  ;;  %v1255_v48 = vmul.f32 %v1223_v5, %v3222_v22 }
 0x20c   : > { %v2624_v31 = vpop.eup %2623  ;;  %2633 = vrcp.f32 %v1132_v25  ;;  %v1134_v16 = vadd.f32 1.0, %v2622_v29  ;;  %v1274_v18 = vpack.c.bf16 %v1254_v51, %v1252_v59 }
 0x20d   : > { %2635 = vrcp.f32 %v1133_v17  ;;  %v1135_v62 = vadd.f32 1.0, %v2624_v31  ;;  %v1275_v35 = vpack.c.bf16 %v1255_v48, %v1253_v24 }
 0x20e   : > { %v2626_v36 = vpop.eup %2625  ;;  %2637 = vrcp.f32 %v1134_v16 }
 0x20f   : > { %v2628_v52 = vpop.eup %2627  ;;  %v1224_v26 = vmul.f32 %v2626_v36, %v3215_v32  ;;  %2639 = vrcp.f32 %v1135_v62  ;;  %1554 = vmatprep.mubr.bf16.mxu1 %v1275_v35 }
 0x210   : > { %v2630_v30 = vpop.eup %2629  ;;  %v1225_v20 = vmul.f32 %v2628_v52, %v3220_v39  ;;  %1555 = vmatmul.mubr.bf16.gmra.mrb[36].mxu1 %v1274_v18 }
 0x211   : > { %v2632_v58 = vpop.eup %2631  ;;  %v1226_v22 = vmul.f32 %v2630_v30, %v3225_v61  ;;  %v1256_v40 = vmul.f32 %v1224_v26, %v3236_v50 }
 0x212   : > { %v1227_v42 = vmul.f32 %v2632_v58, %v3228_v49  ;;  %v1257_v44 = vmul.f32 %v1225_v20, %v3240_v37 }
 0x213   : > { %v1258_v46 = vmul.f32 %v1226_v22, %v3245_v12 }
 0x214   : > { %v1259_v0 = vmul.f32 %v1227_v42, %v3250_v21 }
 0x215   : > { %v1276_v32 = vpack.c.bf16 %v1258_v46, %v1256_v40 }
 0x216   : > { %v2634_v56 = vpop.eup %2633  ;;  %v1277_v7 = vpack.c.bf16 %v1259_v0, %v1257_v44 }
 0x217   : > { %v2636_v53 = vpop.eup %2635  ;;  %v1228_v39 = vmul.f32 %v2634_v56, %v3243_v41 }
 0x218   : > { %v2638_v15 = vpop.eup %2637  ;;  %v1229_v55 = vmul.f32 %v2636_v53, %v3248_v45  ;;  %1564 = vmatprep.mubr.bf16.mxu1 %v1277_v7 }
 0x219   : > { %v2640_v61 = vpop.eup %2639  ;;  %v1230_v50 = vmul.f32 %v2638_v15, %v3253_v9  ;;  %v1260_v49 = vmul.f32 %v1228_v39, %v3262_v34  ;;  %1565 = vmatmul.mubr.bf16.gmra.mrb[40].mxu1 %v1276_v32 }
 0x21a   : > { %v1231_v37 = vmul.f32 %v2640_v61, %v3256_v27  ;;  %v1261_v12 = vmul.f32 %v1229_v55, %v3266_v38 }
 0x21b   : > { %v1262_v21 = vmul.f32 %v1230_v50, %v3270_v10 }
 0x21c   : > { %v1263_v60 = vmul.f32 %v1231_v37, %v3273_v63 }
 0x21d   : > { %v1278_v23 = vpack.c.bf16 %v1262_v21, %v1260_v49 }
 0x21e   : > { %v1279_v41 = vpack.c.bf16 %v1263_v60, %v1261_v12 }
 0x220   : > { %1574 = vmatprep.mubr.bf16.mxu1 %v1279_v41 }
 0x221   : > { %1575 = vmatmul.mubr.bf16.gmra.mrb[44].mxu1 %v1278_v23 }
 0x2b9   : > { %v3300_v45 = vpop.f32.mrb[32].mxu0 }
 0x2ba   : > { %v3302_v3 = vpop.f32.mrb[33].mxu0  ;;  %1589 = vst [vmem:[#allocation2] sm:$0xff] (!%p2181_p2), %v3300_v45 }
 0x2bb   : > { %v3304_v9 = vpop.f32.mrb[34].mxu0  ;;  %1590 = vst [vmem:[#allocation2 + $0x8] sm:$0xff] (!%p2181_p2), %v3302_v3 }
 0x2bc   : > { %v3306_v34 = vpop.f32.mrb[35].mxu0  ;;  %1591 = vst [vmem:[#allocation2 + $0x10] sm:$0xff] (!%p2181_p2), %v3304_v9 }
 0x2bd   : > { %1592 = vst [vmem:[#allocation2 + $0x18] sm:$0xff] (!%p2181_p2), %v3306_v34 }
 0x2c1   : > { %v3308_v43 = vpop.f32.mrb[36].mxu0 }
 0x2c2   : > { %v3310_v27 = vpop.f32.mrb[37].mxu0  ;;  %1593 = vst [vmem:[#allocation2 + $0x20] sm:$0xff] (!%p2181_p2), %v3308_v43 }
 0x2c3   : > { %v3312_v38 = vpop.f32.mrb[38].mxu0  ;;  %1594 = vst [vmem:[#allocation2 + $0x28] sm:$0xff] (!%p2181_p2), %v3310_v27 }
 0x2c4   : > { %v3314_v10 = vpop.f32.mrb[39].mxu0  ;;  %1595 = vst [vmem:[#allocation2 + $0x30] sm:$0xff] (!%p2181_p2), %v3312_v38 }
 0x2c5   : > { %1596 = vst [vmem:[#allocation2 + $0x38] sm:$0xff] (!%p2181_p2), %v3314_v10 }
 0x2ca   : > { %v3316_v63 = vpop.f32.mrb[40].mxu0 }
 0x2cb   : > { %v3318_v4 = vpop.f32.mrb[41].mxu0  ;;  %1597 = vst [vmem:[#allocation2 + $0x40] sm:$0xff] (!%p2181_p2), %v3316_v63 }
 0x2cc   : > { %v3320_v33 = vpop.f32.mrb[42].mxu0  ;;  %1598 = vst [vmem:[#allocation2 + $0x48] sm:$0xff] (!%p2181_p2), %v3318_v4 }
 0x2cd   : > { %v3322_v28 = vpop.f32.mrb[43].mxu0  ;;  %1599 = vst [vmem:[#allocation2 + $0x50] sm:$0xff] (!%p2181_p2), %v3320_v33 }
 0x2ce   : > { %1600 = vst [vmem:[#allocation2 + $0x58] sm:$0xff] (!%p2181_p2), %v3322_v28 }
 0x2d2   : > { %v3324_v6 = vpop.f32.mrb[44].mxu0 }
 0x2d3   : > { %v3326_v47 = vpop.f32.mrb[45].mxu0  ;;  %1601 = vst [vmem:[#allocation2 + $0x60] sm:$0xff] (!%p2181_p2), %v3324_v6 }
 0x2d4   : > { %v3328_v8 = vpop.f32.mrb[46].mxu0  ;;  %1602 = vst [vmem:[#allocation2 + $0x68] sm:$0xff] (!%p2181_p2), %v3326_v47 }
 0x2d5   : > { %v3330_v54 = vpop.f32.mrb[47].mxu0  ;;  %1603 = vst [vmem:[#allocation2 + $0x70] sm:$0xff] (!%p2181_p2), %v3328_v8 }
 0x2d6   : > { %1604 = vst [vmem:[#allocation2 + $0x78] sm:$0xff] (!%p2181_p2), %v3330_v54 }
 0x2db   : > { %v3332_v57 = vpop.f32.mrb[32].mxu1 }
 0x2dc   : > { %v3334_v11 = vpop.f32.mrb[33].mxu1  ;;  %1605 = vst [vmem:[#allocation2 + $0x80] sm:$0xff] (!%p2181_p2), %v3332_v57 }
 0x2dd   : > { %v3336_v2 = vpop.f32.mrb[34].mxu1  ;;  %1606 = vst [vmem:[#allocation2 + $0x88] sm:$0xff] (!%p2181_p2), %v3334_v11 }
 0x2de   : > { %v3338_v1 = vpop.f32.mrb[35].mxu1  ;;  %1607 = vst [vmem:[#allocation2 + $0x90] sm:$0xff] (!%p2181_p2), %v3336_v2 }
 0x2df   : > { %1608 = vst [vmem:[#allocation2 + $0x98] sm:$0xff] (!%p2181_p2), %v3338_v1 }
 0x2e3   : > { %v3340_v14 = vpop.f32.mrb[36].mxu1 }
 0x2e4   : > { %v3342_v59 = vpop.f32.mrb[37].mxu1  ;;  %1609 = vst [vmem:[#allocation2 + $0xa0] sm:$0xff] (!%p2181_p2), %v3340_v14 }
 0x2e5   : > { %v3344_v19 = vpop.f32.mrb[38].mxu1  ;;  %1610 = vst [vmem:[#allocation2 + $0xa8] sm:$0xff] (!%p2181_p2), %v3342_v59 }
 0x2e6   : > { %v3346_v5 = vpop.f32.mrb[39].mxu1  ;;  %1611 = vst [vmem:[#allocation2 + $0xb0] sm:$0xff] (!%p2181_p2), %v3344_v19 }
 0x2e7   : > { %1612 = vst [vmem:[#allocation2 + $0xb8] sm:$0xff] (!%p2181_p2), %v3346_v5 }
 0x2ec   : > { %v3348_v24 = vpop.f32.mrb[40].mxu1 }
 0x2ed   : > { %v3350_v13 = vpop.f32.mrb[41].mxu1  ;;  %1613 = vst [vmem:[#allocation2 + $0xc0] sm:$0xff] (!%p2181_p2), %v3348_v24 }
 0x2ee   : > { %v3352_v25 = vpop.f32.mrb[42].mxu1  ;;  %1614 = vst [vmem:[#allocation2 + $0xc8] sm:$0xff] (!%p2181_p2), %v3350_v13 }
 0x2ef   : > { %v3354_v51 = vpop.f32.mrb[43].mxu1  ;;  %1615 = vst [vmem:[#allocation2 + $0xd0] sm:$0xff] (!%p2181_p2), %v3352_v25 }
 0x2f0   : > { %1616 = vst [vmem:[#allocation2 + $0xd8] sm:$0xff] (!%p2181_p2), %v3354_v51 }
 0x2f1   : > { %1588 = sbr.rel (%p2181_p2) target bundleno = 761 (0x2f9), region = 48 }
 0x2f4   : > { %v3356_v29 = vpop.f32.mrb[44].mxu1 }
 0x2f5   : > { %v3358_v17 = vpop.f32.mrb[45].mxu1  ;;  %1617 = vst [vmem:[#allocation2 + $0xe0] sm:$0xff] (!%p2181_p2), %v3356_v29 }
 0x2f6   : > { %v3360_v48 = vpop.f32.mrb[46].mxu1  ;;  %1618 = vst [vmem:[#allocation2 + $0xe8] sm:$0xff] (!%p2181_p2), %v3358_v17 }
 0x2f7   : > { %v3362_v31 = vpop.f32.mrb[47].mxu1  ;;  %1619 = vst [vmem:[#allocation2 + $0xf0] sm:$0xff] (!%p2181_p2), %v3360_v48 }
 0x2f8   : > { %1620 = vst [vmem:[#allocation2 + $0xf8] sm:$0xff] %v3362_v31 }
 0x2f9 PF: > { %p2182_p4 = scmp.le.s32.totalorder %s2773_s15, 0 }
 0x2fa   : > { %v1625_v16 = vld [vmem:[#allocation2] sm:$0xff] (!%p2182_p4)  ;;  %v1626_v18 = vld [vmem:[#allocation2 + $0x8] sm:$0xff] (!%p2182_p4)  ;;  %v1627_v62 = vld [vmem:[#allocation2 + $0x10] sm:$0xff] (!%p2182_p4) }
 0x2fb   : > { %1624 = sbr.rel (%p2182_p4) target bundleno = 781 (0x30d), region = 52  ;;  %v1657_v35 = vadd.f32 (!%p2182_p4), %v1625_v16, %v3300_v45  ;;  %v1658_v36 = vadd.f32 (!%p2182_p4), %v1626_v18, %v3302_v3  ;;  %v1659_v52 = vadd.f32 (!%p2182_p4), %v1627_v62, %v3304_v9  ;;  %v1628_v26 = vld [vmem:[#allocation2 + $0x18] sm:$0xff] (!%p2182_p4)  ;;  %v1629_v30 = vld [vmem:[#allocation2 + $0x20] sm:$0xff] (!%p2182_p4)  ;;  %v1630_v20 = vld [vmem:[#allocation2 + $0x28] sm:$0xff] (!%p2182_p4) }
 0x2fc   : > { %v1660_v58 = vadd.f32 (!%p2182_p4), %v1628_v26, %v3306_v34  ;;  %v1661_v22 = vadd.f32 (!%p2182_p4), %v1629_v30, %v3308_v43  ;;  %v1662_v40 = vadd.f32 (!%p2182_p4), %v1630_v20, %v3310_v27  ;;  %v1631_v42 = vld [vmem:[#allocation2 + $0x30] sm:$0xff] (!%p2182_p4)  ;;  %v1632_v44 = vld [vmem:[#allocation2 + $0x38] sm:$0xff] (!%p2182_p4)  ;;  %v1633_v46 = vld [vmem:[#allocation2 + $0x40] sm:$0xff] (!%p2182_p4) }
 0x2fd   : > { %1689 = vst [vmem:[#allocation2] sm:$0xff] (!%p2182_p4), %v1657_v35  ;;  %1690 = vst [vmem:[#allocation2 + $0x8] sm:$0xff] (!%p2182_p4), %v1658_v36  ;;  %v1663_v0 = vadd.f32 (!%p2182_p4), %v1631_v42, %v3312_v38  ;;  %v1664_v32 = vadd.f32 (!%p2182_p4), %v1632_v44, %v3314_v10  ;;  %v1665_v56 = vadd.f32 (!%p2182_p4), %v1633_v46, %v3316_v63  ;;  %v1634_v7 = vld [vmem:[#allocation2 + $0x48] sm:$0xff] (!%p2182_p4)  ;;  %v1635_v53 = vld [vmem:[#allocation2 + $0x50] sm:$0xff] (!%p2182_p4) }
 0x2fe   : > { %1691 = vst [vmem:[#allocation2 + $0x10] sm:$0xff] (!%p2182_p4), %v1659_v52  ;;  %v1636_v39 = vld [vmem:[#allocation2 + $0x58] sm:$0xff] (!%p2182_p4)  ;;  %1692 = vst [vmem:[#allocation2 + $0x18] sm:$0xff] (!%p2182_p4), %v1660_v58  ;;  %v1666_v15 = vadd.f32 (!%p2182_p4), %v1634_v7, %v3318_v4  ;;  %v1667_v55 = vadd.f32 (!%p2182_p4), %v1635_v53, %v3320_v33  ;;  %v1637_v50 = vld [vmem:[#allocation2 + $0x60] sm:$0xff] (!%p2182_p4) }
 0x2ff   : > { %1693 = vst [vmem:[#allocation2 + $0x20] sm:$0xff] (!%p2182_p4), %v1661_v22  ;;  %1694 = vst [vmem:[#allocation2 + $0x28] sm:$0xff] (!%p2182_p4), %v1662_v40  ;;  %v1668_v61 = vadd.f32 (!%p2182_p4), %v1636_v39, %v3322_v28  ;;  %v1638_v49 = vld [vmem:[#allocation2 + $0x68] sm:$0xff] (!%p2182_p4)  ;;  %v1639_v37 = vld [vmem:[#allocation2 + $0x70] sm:$0xff] (!%p2182_p4)  ;;  %v1669_v12 = vadd.f32 (!%p2182_p4), %v1637_v50, %v3324_v6 }
 0x300   : > { %1695 = vst [vmem:[#allocation2 + $0x30] sm:$0xff] (!%p2182_p4), %v1663_v0  ;;  %1696 = vst [vmem:[#allocation2 + $0x38] sm:$0xff] (!%p2182_p4), %v1664_v32  ;;  %v1670_v21 = vadd.f32 (!%p2182_p4), %v1638_v49, %v3326_v47  ;;  %v1671_v60 = vadd.f32 (!%p2182_p4), %v1639_v37, %v3328_v8  ;;  %v1640_v23 = vld [vmem:[#allocation2 + $0x78] sm:$0xff] (!%p2182_p4)  ;;  %v1641_v41 = vld [vmem:[#allocation2 + $0x80] sm:$0xff] (!%p2182_p4) }
 0x301   : > { %1697 = vst [vmem:[#allocation2 + $0x40] sm:$0xff] (!%p2182_p4), %v1665_v56  ;;  %v1642_v45 = vld [vmem:[#allocation2 + $0x88] sm:$0xff] (!%p2182_p4)  ;;  %1698 = vst [vmem:[#allocation2 + $0x48] sm:$0xff] (!%p2182_p4), %v1666_v15  ;;  %v1672_v3 = vadd.f32 (!%p2182_p4), %v1640_v23, %v3330_v54  ;;  %v1673_v9 = vadd.f32 (!%p2182_p4), %v1641_v41, %v3332_v57  ;;  %v1643_v43 = vld [vmem:[#allocation2 + $0x90] sm:$0xff] (!%p2182_p4) }
 0x302   : > { %1699 = vst [vmem:[#allocation2 + $0x50] sm:$0xff] %v1667_v55  ;;  %1700 = vst [vmem:[#allocation2 + $0x58] sm:$0xff] %v1668_v61  ;;  %v1674_v34 = vadd.f32 %v1642_v45, %v3334_v11  ;;  %v1644_v27 = vld [vmem:[#allocation2 + $0x98] sm:$0xff]  ;;  %v1645_v38 = vld [vmem:[#allocation2 + $0xa0] sm:$0xff]  ;;  %v1675_v10 = vadd.f32 %v1643_v43, %v3336_v2 }
 0x303   : > { %1701 = vst [vmem:[#allocation2 + $0x60] sm:$0xff] %v1669_v12  ;;  %1702 = vst [vmem:[#allocation2 + $0x68] sm:$0xff] %v1670_v21  ;;  %v1676_v63 = vadd.f32 %v1644_v27, %v3338_v1  ;;  %v1677_v4 = vadd.f32 %v1645_v38, %v3340_v14  ;;  %v1646_v33 = vld [vmem:[#allocation2 + $0xa8] sm:$0xff]  ;;  %v1647_v28 = vld [vmem:[#allocation2 + $0xb0] sm:$0xff] }
 0x304   : > { %1703 = vst [vmem:[#allocation2 + $0x70] sm:$0xff] %v1671_v60  ;;  %v1648_v6 = vld [vmem:[#allocation2 + $0xb8] sm:$0xff]  ;;  %1704 = vst [vmem:[#allocation2 + $0x78] sm:$0xff] %v1672_v3  ;;  %v1678_v47 = vadd.f32 %v1646_v33, %v3342_v59  ;;  %v1679_v8 = vadd.f32 %v1647_v28, %v3344_v19  ;;  %v1649_v57 = vld [vmem:[#allocation2 + $0xc0] sm:$0xff] }
 0x305   : > { %1705 = vst [vmem:[#allocation2 + $0x80] sm:$0xff] %v1673_v9  ;;  %1706 = vst [vmem:[#allocation2 + $0x88] sm:$0xff] %v1674_v34  ;;  %v1680_v54 = vadd.f32 %v1648_v6, %v3346_v5  ;;  %v1650_v11 = vld [vmem:[#allocation2 + $0xc8] sm:$0xff]  ;;  %v1651_v16 = vld [vmem:[#allocation2 + $0xd0] sm:$0xff]  ;;  %v1681_v2 = vadd.f32 %v1649_v57, %v3348_v24 }
 0x306   : > { %1707 = vst [vmem:[#allocation2 + $0x90] sm:$0xff] %v1675_v10  ;;  %1708 = vst [vmem:[#allocation2 + $0x98] sm:$0xff] %v1676_v63  ;;  %v1682_v1 = vadd.f32 %v1650_v11, %v3350_v13  ;;  %v1683_v14 = vadd.f32 %v1651_v16, %v3352_v25  ;;  %v1652_v18 = vld [vmem:[#allocation2 + $0xd8] sm:$0xff]  ;;  %v1653_v62 = vld [vmem:[#allocation2 + $0xe0] sm:$0xff] }
 0x307   : > { %1709 = vst [vmem:[#allocation2 + $0xa0] sm:$0xff] %v1677_v4  ;;  %v1654_v35 = vld [vmem:[#allocation2 + $0xe8] sm:$0xff]  ;;  %1710 = vst [vmem:[#allocation2 + $0xa8] sm:$0xff] %v1678_v47  ;;  %v1684_v59 = vadd.f32 %v1652_v18, %v3354_v51  ;;  %v1685_v19 = vadd.f32 %v1653_v62, %v3356_v29  ;;  %v1655_v36 = vld [vmem:[#allocation2 + $0xf0] sm:$0xff] }
 0x308   : > { %1711 = vst [vmem:[#allocation2 + $0xb0] sm:$0xff] %v1679_v8  ;;  %1712 = vst [vmem:[#allocation2 + $0xb8] sm:$0xff] %v1680_v54  ;;  %v1686_v5 = vadd.f32 %v1654_v35, %v3358_v17  ;;  %v1656_v52 = vld [vmem:[#allocation2 + $0xf8] sm:$0xff]  ;;  %v1687_v24 = vadd.f32 %v1655_v36, %v3360_v48 }
 0x309   : > { %1713 = vst [vmem:[#allocation2 + $0xc0] sm:$0xff] %v1681_v2  ;;  %1714 = vst [vmem:[#allocation2 + $0xc8] sm:$0xff] %v1682_v1  ;;  %v1688_v13 = vadd.f32 %v1656_v52, %v3362_v31 }
 0x30a   : > { %1715 = vst [vmem:[#allocation2 + $0xd0] sm:$0xff] %v1683_v14  ;;  %1716 = vst [vmem:[#allocation2 + $0xd8] sm:$0xff] %v1684_v59 }
 0x30b   : > { %1717 = vst [vmem:[#allocation2 + $0xe0] sm:$0xff] %v1685_v19  ;;  %1718 = vst [vmem:[#allocation2 + $0xe8] sm:$0xff] %v1686_v5 }
 0x30c   : > { %1719 = vst [vmem:[#allocation2 + $0xf0] sm:$0xff] %v1687_v24  ;;  %1720 = vst [vmem:[#allocation2 + $0xf8] sm:$0xff] %v1688_v13 }
 0x30d PF: > { %p2183_p6 = scmp.ne.s32.totalorder %s2773_s15, 1 }
 0x30e   : > { %v1737_v7 = vld [vmem:[#allocation2 + $0x60] sm:$0xff] (!%p2183_p6)  ;;  %v1738_v53 = vld [vmem:[#allocation2 + $0x68] sm:$0xff] (!%p2183_p6)  ;;  %v1739_v39 = vld [vmem:[#allocation2 + $0x70] sm:$0xff] (!%p2183_p6) }
 0x30f   : > { %1724 = sbr.rel (%p2183_p6) target bundleno = 797 (0x31d), region = 56  ;;  %v1725_v25 = vld [vmem:[#allocation2] sm:$0xff] (!%p2183_p6)  ;;  %v1726_v51 = vld [vmem:[#allocation2 + $0x8] sm:$0xff] (!%p2183_p6)  ;;  %v2213_v15 = vpack.c.bf16 (!%p2183_p6), %v1738_v53, %v1737_v7  ;;  %v1740_v55 = vld [vmem:[#allocation2 + $0x78] sm:$0xff] (!%p2183_p6) }
 0x310   : > { %v1727_v29 = vld [vmem:[#allocation2 + $0x10] sm:$0xff] (!%p2183_p6)  ;;  %v2207_v17 = vpack.c.bf16 (!%p2183_p6), %v1726_v51, %v1725_v25  ;;  %v1728_v26 = vld [vmem:[#allocation2 + $0x18] sm:$0xff] (!%p2183_p6)  ;;  %v1741_v61 = vld [vmem:[#allocation2 + $0x80] sm:$0xff] (!%p2183_p6)  ;;  %v2214_v49 = vpack.c.bf16 (!%p2183_p6), %v1740_v55, %v1739_v39 }
 0x311   : > { %v1729_v30 = vld [vmem:[#allocation2 + $0x20] sm:$0xff] (!%p2183_p6)  ;;  %v1730_v20 = vld [vmem:[#allocation2 + $0x28] sm:$0xff] (!%p2183_p6)  ;;  %v2208_v58 = vpack.c.bf16 (!%p2183_p6), %v1728_v26, %v1727_v29  ;;  %v1743_v12 = vld [vmem:[#allocation2 + $0x90] sm:$0xff] (!%p2183_p6)  ;;  %1859 = vst [vmem:[#allocation9 + $0x30] sm:$0xff] (!%p2183_p6), %v2213_v15 }
 0x312   : > { %v2209_v48 = vpack.c.bf16 (!%p2183_p6), %v1730_v20, %v1729_v30  ;;  %v1731_v22 = vld [vmem:[#allocation2 + $0x30] sm:$0xff] (!%p2183_p6)  ;;  %v1732_v31 = vld [vmem:[#allocation2 + $0x38] sm:$0xff] (!%p2183_p6)  ;;  %1853 = vst [vmem:[#allocation9] sm:$0xff] (!%p2183_p6), %v2207_v17  ;;  %v1742_v50 = vld [vmem:[#allocation2 + $0x88] sm:$0xff] (!%p2183_p6) }
 0x313   : > { %v1733_v40 = vld [vmem:[#allocation2 + $0x40] sm:$0xff] (!%p2183_p6)  ;;  %v2210_v42 = vpack.c.bf16 (!%p2183_p6), %v1732_v31, %v1731_v22  ;;  %v1734_v44 = vld [vmem:[#allocation2 + $0x48] sm:$0xff] (!%p2183_p6)  ;;  %1854 = vst [vmem:[#allocation9 + $0x8] sm:$0xff] (!%p2183_p6), %v2208_v58  ;;  %v2215_v37 = vpack.c.bf16 (!%p2183_p6), %v1742_v50, %v1741_v61  ;;  %v1744_v21 = vld [vmem:[#allocation2 + $0x98] sm:$0xff] (!%p2183_p6) }
 0x314   : > { %v1735_v46 = vld [vmem:[#allocation2 + $0x50] sm:$0xff] (!%p2183_p6)  ;;  %v1736_v0 = vld [vmem:[#allocation2 + $0x58] sm:$0xff] (!%p2183_p6)  ;;  %1855 = vst [vmem:[#allocation9 + $0x10] sm:$0xff] (!%p2183_p6), %v2209_v48  ;;  %v2211_v32 = vpack.c.bf16 (!%p2183_p6), %v1734_v44, %v1733_v40  ;;  %v1745_v60 = vld [vmem:[#allocation2 + $0xa0] sm:$0xff] (!%p2183_p6)  ;;  %v2216_v23 = vpack.c.bf16 (!%p2183_p6), %v1744_v21, %v1743_v12 }
 0x315   : > { %v2212_v56 = vpack.c.bf16 (!%p2183_p6), %v1736_v0, %v1735_v46  ;;  %1856 = vst [vmem:[#allocation9 + $0x18] sm:$0xff] (!%p2183_p6), %v2210_v42  ;;  %v1746_v41 = vld [vmem:[#allocation2 + $0xa8] sm:$0xff] (!%p2183_p6)  ;;  %v1747_v45 = vld [vmem:[#allocation2 + $0xb0] sm:$0xff] (!%p2183_p6)  ;;  %v1748_v3 = vld [vmem:[#allocation2 + $0xb8] sm:$0xff] (!%p2183_p6) }
 0x316   : > { %1857 = vst [vmem:[#allocation9 + $0x20] sm:$0xff] %v2211_v32  ;;  %1860 = vst [vmem:[#allocation9 + $0x38] sm:$0xff] %v2214_v49  ;;  %v2217_v9 = vpack.c.bf16 %v1746_v41, %v1745_v60  ;;  %v2218_v34 = vpack.c.bf16 %v1748_v3, %v1747_v45  ;;  %v1749_v43 = vld [vmem:[#allocation2 + $0xc0] sm:$0xff]  ;;  %v1750_v27 = vld [vmem:[#allocation2 + $0xc8] sm:$0xff] }
 0x317   : > { %1858 = vst [vmem:[#allocation9 + $0x28] sm:$0xff] %v2212_v56  ;;  %1861 = vst [vmem:[#allocation9 + $0x40] sm:$0xff] %v2215_v37  ;;  %v1751_v38 = vld [vmem:[#allocation2 + $0xd0] sm:$0xff]  ;;  %v2219_v10 = vpack.c.bf16 %v1750_v27, %v1749_v43  ;;  %v1752_v63 = vld [vmem:[#allocation2 + $0xd8] sm:$0xff] }
 0x318   : > { %1862 = vst [vmem:[#allocation9 + $0x48] sm:$0xff] %v2216_v23  ;;  %v1753_v4 = vld [vmem:[#allocation2 + $0xe0] sm:$0xff]  ;;  %v1754_v33 = vld [vmem:[#allocation2 + $0xe8] sm:$0xff]  ;;  %1863 = vst [vmem:[#allocation9 + $0x50] sm:$0xff] %v2217_v9  ;;  %v2220_v28 = vpack.c.bf16 %v1752_v63, %v1751_v38 }
 0x319   : > { %1864 = vst [vmem:[#allocation9 + $0x58] sm:$0xff] %v2218_v34  ;;  %v2221_v6 = vpack.c.bf16 %v1754_v33, %v1753_v4  ;;  %v1755_v47 = vld [vmem:[#allocation2 + $0xf0] sm:$0xff]  ;;  %v1756_v8 = vld [vmem:[#allocation2 + $0xf8] sm:$0xff]  ;;  %1865 = vst [vmem:[#allocation9 + $0x60] sm:$0xff] %v2219_v10 }
 0x31a   : > { %v2222_v54 = vpack.c.bf16 %v1756_v8, %v1755_v47  ;;  %1866 = vst [vmem:[#allocation9 + $0x68] sm:$0xff] %v2220_v28 }
 0x31b   : > { %1867 = vst [vmem:[#allocation9 + $0x70] sm:$0xff] %v2221_v6 }
 0x31c   : > { %1868 = vst [vmem:[#allocation9 + $0x78] sm:$0xff] %v2222_v54 }
 0x31d PF: > { %p2280_p7 = scmp.eq.s32.totalorder %s2848_s18, 1  ;;  %s2796_s15 = smov [#allocation9]  }
 0x31e   : > { %s1881_s11 = sshll.u32 %s2796_s15, 4  ;;  %s1882_s11 = int_to_ptr.vmem [resolvable:$true] %s1881_s11 }
 0x31f   : > { %s2697_s22 = scalar_lea.vmem %s1882_s11, 2048  ;;  %p2704_p5 = scmp.lt.s32.totalorder %s1882_s11, %s1882_s11 }
 0x320   : > { %p2698_p9 = scmp.ne.s32.totalorder %s1882_s11, %s2697_s22  ;;  %p2705_p8 = scmp.lt.s32.totalorder %s2697_s22, %s2697_s22 }
 0x322   : > { %p2699_p11 = pnand %p2698_p9, %p2280_p7  ;;  %p2706_p12 = por %p2705_p8, %p2704_p5 }
 0x324   : > { %p2700_p13 = pneg %p2699_p11 }
 0x326   : > { %p2707_p10 = pnand %p2706_p12, %p2700_p13 }
 0x328   : > { %2710 = shalt.err (!%p2707_p10)
}
 0x329   : > { %s2711_s29 = scalar_lea.hbm %s3475_s3, 2048 }
 0x32a   : > { %p2712_p0 = scmp.ne.s32.totalorder %s3475_s3, %s2711_s29  ;;  %p2717_p2 = scmp.lt.u32.totalorder %s2711_s29, %s3475_s3 }
 0x32c   : > { %p2713_p1 = pnand %p2712_p0, %p2280_p7 }
 0x32e   : > { %p2714_p3 = pneg %p2713_p1 }
 0x330   : > { %p2719_p4 = pnand %p2717_p2, %p2714_p3 }
 0x332   : > { %2722 = shalt.err (!%p2719_p4)
}
 0x333   : > { %s2797_s9 = smov 128   ;;  %s2798_s10 = smov 8  }
 0x334   : > { %2271 = dma.vmem_to_hbm [thread:$0]  (%p2280_p7), %s1882_s11, 2048, %s3475_s3, [#allocation5], %s2797_s9, %s2797_s9, %s2798_s10  }
 0x335   : > { %2756 = dma.done.wait (%p2280_p7), [#allocation5], 2048  }
 0x336   : > { %2758 = vsyncadd (%p2280_p7), [#allocation5], 4294965248 }
 0x337 PF: > { %s18_s17 = sadd.s32 1, %s2781_s17   ;;  %s3489_s12 = smov %s2765_s13 }
 0x338   : > { %p15_p6 = scmp.ge.s32.totalorder %s18_s17, 4   ;;  %s3490_s13 = smov %s2769_s14 }
 0x339   : > { %s3491_s14 = smov %s2874_s24  ;;  %s3492_s15 = smov %s2777_s16 }
 0x33a   : > { %s3493_s16 = smov %s3495_s19  ;;  %17 = sbr.rel (!%p15_p6) target bundleno = 6 (0x6), region = 105 }
 0x341   :  { %1897 = vsyncpa [#allocation4], 1 }
 0x342   :  { %1899 = vsyncpa [#allocation4 + $0x1], 1 }
 0x343   :  { %1900 = vsyncpa [#allocation7], 1 }
 0x344   :  { %1902 = vsyncpa [#allocation7 + $0x1], 1 }
 0x345   :  { %1903 = vsyncpa [#allocation5], 1 }
 0x346   :  { %1905 = vsyncpa [#allocation5 + $0x1], 1 }

</bundles_post_ra>
